<compile_context>
chip_gen: v5e
topology: v5e:2x2
jax: 0.10.0
libtpu: 0.0.40
codegen_flags: <defaults>
</compile_context>

<pallas_src>
import functools

import jax
import jax.numpy as jnp
from jax import lax
from jax.experimental import pallas as pl
from jax.experimental.pallas import tpu as pltpu


# ----------------------------------------------------------------------------
# Pallas kernel: per-scale MLP (1x1 conv + folded BN + ReLU) + max over K
# ----------------------------------------------------------------------------
def _msg_mlp_kernel(num_layers, nsample, x_ref, *rest):
    # rest = (w_0, scale_0, shift_0, ..., w_{L-1}, scale_{L-1}, shift_{L-1}, out_ref)
    out_ref = rest[-1]
    params = rest[:-1]

    xf = x_ref[...]                                   # (Cin, T*K), bf16
    for l in range(num_layers):
        w = params[3 * l][...]                        # (Cout_l, Cin_l), bf16
        sc = params[3 * l + 1][...]                   # (Cout_l, 1), f32
        sh = params[3 * l + 2][...]                   # (Cout_l, 1), f32
        y = jnp.dot(w, xf, preferred_element_type=jnp.float32)   # MXU, f32 acc
        y = jnp.maximum(y * sc + sh, 0.0)             # folded BN + ReLU, f32 on VPU
        xf = y.astype(jnp.bfloat16) if l + 1 < num_layers else y

    cout, cols = xf.shape
    t = cols // nsample
    # max-pool over the K grouped neighbors (torch.max(..., dim=3)[0]);
    # last axis is k (k-minor ordering in the wrapper).
    pooled = jnp.max(xf.reshape(cout, t, nsample), axis=-1)       # (Cout, T)
    out_ref[...] = pooled.astype(out_ref.dtype)


def _choose_tile_s(S, K, cin, cout_max, max_block_bytes=4 * 1024 * 1024):
    """Largest tile over the sampled-point axis that is Pallas-legal and fits budget.

    Legal tiles: tile == S (block equals full dim), or a divisor of S that is a
    multiple of 128 (so the (Cin, tile*K) input block and the (Cout, tile)
    output block both satisfy the (8, 128) lane constraint).
    """
    per_col_bytes = K * (cin * 2 + 2 * cout_max * 4)   # bf16 input + f32 activations
    candidates = [S]
    t = 128
    while t < S:
        if S % t == 0:
            candidates.append(t)
        t += 128
    fitting = [c for c in candidates if c * per_col_bytes <= max_block_bytes]
    return max(fitting) if fitting else min(candidates)


def msg_mlp_maxpool(grouped, layer_params, nsample):
    """grouped: [B, Cin, S*K] (bf16, s-major / k-minor).  Returns [B, Cout, S] f32."""
    B, Cin, SK = grouped.shape
    K = nsample
    S = SK // K
    num_layers = len(layer_params)
    cout = layer_params[-1][0].shape[0]
    cout_max = max(int(w.shape[0]) for (w, _, _) in layer_params)

    tile_s = _choose_tile_s(S, K, Cin, cout_max)
    grid = (B, S // tile_s)

    in_specs = [pl.BlockSpec((None, Cin, tile_s * K), lambda b, j: (b, 0, j))]
    args = [grouped]
    for (w, sc, sh) in layer_params:
        # Constant index_map -> weights/scales stay resident across grid steps.
        in_specs.append(pl.BlockSpec(w.shape, lambda b, j: (0, 0)))
        in_specs.append(pl.BlockSpec(sc.shape, lambda b, j: (0, 0)))
        in_specs.append(pl.BlockSpec(sh.shape, lambda b, j: (0, 0)))
        args.extend([w, sc, sh])

    out_spec = pl.BlockSpec((None, cout, tile_s), lambda b, j: (b, 0, j))
    kernel = functools.partial(_msg_mlp_kernel, num_layers, K)

    # Kernel is HBM-bound (tiny channel counts never saturate the MXU); give XLA
    # the true byte traffic so it schedules around it.
    flops = 2 * B * SK * sum(int(w.shape[0]) * int(w.shape[1])
                             for (w, _, _) in layer_params)
    bytes_accessed = (grouped.size * grouped.dtype.itemsize
                      + B * S * cout * 4
                      + sum(w.size * w.dtype.itemsize + sc.size * 4 + sh.size * 4
                            for (w, sc, sh) in layer_params))

    return pl.pallas_call(
        kernel,
        out_shape=jax.ShapeDtypeStruct((B, cout, S), jnp.float32),
        grid_spec=pltpu.PrefetchScalarGridSpec(
            num_scalar_prefetch=0,
            grid=grid,
            in_specs=in_specs,
            out_specs=out_spec,
        ),
        compiler_params=pltpu.CompilerParams(
            dimension_semantics=("parallel", "parallel"),
            vmem_limit_bytes=48 * 1024 * 1024,   # below v7x 64 MiB physical; plenty on v5e/v6e
        ),
        cost_estimate=pl.CostEstimate(flops=flops, transcendentals=0,
                                      bytes_accessed=bytes_accessed),
    )(*args)


# ----------------------------------------------------------------------------
# Plain-JAX glue: FPS, ball query, gathers (data-dependent indexing)
# ----------------------------------------------------------------------------
def furthest_point_sample(xyz_t, npoint):
    """xyz_t: [B, N, 3] -> indices [B, npoint] (starts at point 0, CUDA semantics)."""
    B, N, _ = xyz_t.shape

    def body(i, state):
        centroids, dist, farthest = state
        centroids = centroids.at[:, i].set(farthest)
        centroid = jnp.take_along_axis(xyz_t, farthest[:, None, None], axis=1)  # (B,1,3)
        d = jnp.sum((xyz_t - centroid) ** 2, axis=-1)
        dist = jnp.minimum(dist, d)
        farthest = jnp.argmax(dist, axis=-1).astype(jnp.int32)
        return centroids, dist, farthest

    centroids = jnp.zeros((B, npoint), jnp.int32)
    dist = jnp.full((B, N), 1e10, jnp.float32)
    farthest = jnp.zeros((B,), jnp.int32)
    centroids, _, _ = lax.fori_loop(0, npoint, body, (centroids, dist, farthest))
    return centroids


def query_ball_point(radius, nsample, xyz_t, new_xyz_t):
    """xyz_t: [B,N,3], new_xyz_t: [B,S,3] -> idx [B,S,nsample]."""
    B, N, _ = xyz_t.shape
    S = new_xyz_t.shape[1]
    sqrdists = jnp.sum((new_xyz_t[:, :, None, :] - xyz_t[:, None, :, :]) ** 2, axis=-1)
    group_idx = jnp.broadcast_to(jnp.arange(N, dtype=jnp.int32), (B, S, N))
    group_idx = jnp.where(sqrdists > radius ** 2, N, group_idx)
    group_idx = jnp.sort(group_idx, axis=-1)[:, :, :nsample]
    group_first = group_idx[:, :, :1]
    # If no point lies within radius, index stays N and the gather's OOB clamp
    # picks point N-1 (same degenerate case as the PyTorch reference).
    group_idx = jnp.where(group_idx == N, group_first, group_idx)
    return group_idx


# ----------------------------------------------------------------------------
# Module forward
# ----------------------------------------------------------------------------
def pointnet_sa_msg_forward(xyz, points, npoint, radius_list, nsample_list,
                            scale_params, use_xyz=True):
    """xyz: [B,3,N], points: [B,D,N] -> (new_xyz [B,3,S], new_points [B,sum(Cout),S])."""
    B, _, N = xyz.shape
    xyz_t = jnp.transpose(xyz, (0, 2, 1))                        # [B, N, 3]

    fps_idx = furthest_point_sample(xyz_t, npoint)               # [B, S]
    new_xyz_t = jnp.take_along_axis(
        xyz_t, jnp.broadcast_to(fps_idx[:, :, None], (B, npoint, 3)), axis=1)  # [B,S,3]
    new_xyz = jnp.transpose(new_xyz_t, (0, 2, 1))                # [B, 3, S]

    S = npoint
    D = points.shape[1]
    new_points_list = []
    for i, (radius, nsample) in enumerate(zip(radius_list, nsample_list)):
        idx = query_ball_point(radius, nsample, xyz_t, new_xyz_t)   # [B, S, K]
        K = nsample
        idx_flat = idx.reshape(B, 1, S * K)                          # s-major, k-minor

        # Channel-major gathers straight from the [B, C, N] inputs -> [B, C, S*K]
        grouped_xyz = jnp.take_along_axis(
            xyz, jnp.broadcast_to(idx_flat, (B, 3, S * K)), axis=2)
        grouped_xyz = grouped_xyz.reshape(B, 3, S, K) - new_xyz[:, :, :, None]
        grouped_feats = jnp.take_along_axis(
            points, jnp.broadcast_to(idx_flat, (B, D, S * K)), axis=2)
        if use_xyz:
            grouped = jnp.concatenate(
                [grouped_xyz.reshape(B, 3, S * K), grouped_feats], axis=1)
        else:
            grouped = grouped_feats

        grouped = grouped.astype(jnp.bfloat16)   # halve HBM traffic into the kernel
        pooled = msg_mlp_maxpool(grouped, scale_params[i], nsample)  # [B, Cout, S] f32
        new_points_list.append(pooled)

    new_points_concat = jnp.concatenate(new_points_list, axis=1)
    return new_xyz, new_points_concat


# ----------------------------------------------------------------------------
# Deterministic parameter init (Conv2d 1x1 + BatchNorm2d folded, eval mode)
# ----------------------------------------------------------------------------
def init_params(key, in_channel, mlp_list, use_xyz=True):
    eps = 1e-5
    scale_params = []
    for mlp_spec in mlp_list:
        last = in_channel + (3 if use_xyz else 0)
        layers = []
        for out_ch in mlp_spec:
            key, k1, k2, k3, k4, k5, k6 = jax.random.split(key, 7)
            w = 0.1 * jax.random.normal(k1, (out_ch, last), jnp.float32)     # conv weight
            b = 0.1 * jax.random.normal(k2, (out_ch,), jnp.float32)          # conv bias
            gamma = 1.0 + 0.1 * jax.random.normal(k3, (out_ch,), jnp.float32)
            beta = 0.1 * jax.random.normal(k4, (out_ch,), jnp.float32)
            rmean = 0.1 * jax.random.normal(k5, (out_ch,), jnp.float32)
            rvar = 1.0 + jnp.abs(jax.random.normal(k6, (out_ch,), jnp.float32))
            scale = gamma / jnp.sqrt(rvar + eps)
            shift = beta + scale * (b - rmean)
            layers.append((w.astype(jnp.bfloat16),        # (Cout, Cin) for channel-major matmul
                           scale[:, None].astype(jnp.float32),
                           shift[:, None].astype(jnp.float32)))
            last = out_ch
        scale_params.append(layers)
    return scale_params


if __name__ == "__main__":
    key = jax.random.PRNGKey(0)
    k_xyz, k_pts, k_par = jax.random.split(key, 3)

    # Small shapes: B=2, N=32 points, D=4 feature channels, S=npoint=8
    B, N, D = 2, 32, 4
    npoint = 8
    radius_list = [0.2, 0.4]
    nsample_list = [8, 16]
    in_channel = D
    mlp_list = [[16, 32], [16, 32]]

    xyz = jax.random.uniform(k_xyz, (B, 3, N), jnp.float32)      # [B, 3, N]
    points = jax.random.normal(k_pts, (B, D, N), jnp.float32)    # [B, D, N]

    scale_params = init_params(k_par, in_channel, mlp_list, use_xyz=True)

    fwd = jax.jit(functools.partial(
        pointnet_sa_msg_forward,
        npoint=npoint,
        radius_list=tuple(radius_list),
        nsample_list=tuple(nsample_list),
        use_xyz=True))

    new_xyz, new_points = fwd(xyz, points, scale_params=scale_params)

    jax.block_until_ready((new_xyz, new_points))
    assert new_xyz.shape == (B, 3, npoint)
    assert new_points.shape == (B, sum(m[-1] for m in mlp_list), npoint)
    assert bool(jnp.all(jnp.isfinite(new_points)))
    print("KERNEL_OK")
</pallas_src>

<mosaic_0001>
module attributes {stable_mosaic.version = 11 : i64} {
  func.func @_msg_mlp_kernel(%arg0: i32, %arg1: i32, %arg2: memref<1x7x64xbf16, #tpu.memory_space<vmem>>, %arg3: memref<16x7xbf16, #tpu.memory_space<vmem>>, %arg4: memref<16x1xf32, #tpu.memory_space<vmem>>, %arg5: memref<16x1xf32, #tpu.memory_space<vmem>>, %arg6: memref<32x16xbf16, #tpu.memory_space<vmem>>, %arg7: memref<32x1xf32, #tpu.memory_space<vmem>>, %arg8: memref<32x1xf32, #tpu.memory_space<vmem>>, %arg9: memref<1x32x8xf32, #tpu.memory_space<vmem>>) attributes {dimension_semantics = [#tpu.dimension_semantics<parallel>, #tpu.dimension_semantics<parallel>], iteration_bounds = array<i64: 2, 1>, scalar_prefetch = 0 : i64, scratch_operands = 0 : i64, tpu.core_type = #tpu.core_type<tc>, window_params = [{transform_indices = @transform_0, window_bounds = array<i64: 1, 7, 64>}, {pipeline_mode = #tpu.pipeline_mode<synchronous>, transform_indices = @transform_1, window_bounds = array<i64: 16, 7>}, {pipeline_mode = #tpu.pipeline_mode<synchronous>, transform_indices = @transform_2, window_bounds = array<i64: 16, 1>}, {pipeline_mode = #tpu.pipeline_mode<synchronous>, transform_indices = @transform_3, window_bounds = array<i64: 16, 1>}, {pipeline_mode = #tpu.pipeline_mode<synchronous>, transform_indices = @transform_4, window_bounds = array<i64: 32, 16>}, {pipeline_mode = #tpu.pipeline_mode<synchronous>, transform_indices = @transform_5, window_bounds = array<i64: 32, 1>}, {pipeline_mode = #tpu.pipeline_mode<synchronous>, transform_indices = @transform_6, window_bounds = array<i64: 32, 1>}, {transform_indices = @transform_7, window_bounds = array<i64: 1, 32, 8>}]} {
    %c0 = arith.constant 0 : index
    %c0_0 = arith.constant 0 : index
    %c0_1 = arith.constant 0 : index
    %0 = vector.load %arg2[%c0, %c0_0, %c0_1] : memref<1x7x64xbf16, #tpu.memory_space<vmem>>, vector<1x7x64xbf16>
    %1 = vector.shape_cast %0 : vector<1x7x64xbf16> to vector<7x64xbf16>
    %c0_2 = arith.constant 0 : index
    %c0_3 = arith.constant 0 : index
    %2 = vector.load %arg3[%c0_2, %c0_3] : memref<16x7xbf16, #tpu.memory_space<vmem>>, vector<16x7xbf16>
    %c0_4 = arith.constant 0 : index
    %c0_5 = arith.constant 0 : index
    %3 = vector.load %arg4[%c0_4, %c0_5] : memref<16x1xf32, #tpu.memory_space<vmem>>, vector<16x1xf32>
    %c0_6 = arith.constant 0 : index
    %c0_7 = arith.constant 0 : index
    %4 = vector.load %arg5[%c0_6, %c0_7] : memref<16x1xf32, #tpu.memory_space<vmem>>, vector<16x1xf32>
    %cst = arith.constant dense<0.000000e+00> : vector<16x64xf32>
    %5 = tpu.matmul %2, %1, %cst {dimension_numbers = #tpu.dot_dimension_numbers<[1], [0], [0], [1], [0, 0, 1, 1], [], []>} : vector<16x7xbf16>, vector<7x64xbf16>, vector<16x64xf32> -> vector<16x64xf32>
    %6 = vector.broadcast %3 : vector<16x1xf32> to vector<16x64xf32>
    %7 = arith.mulf %5, %6 : vector<16x64xf32>
    %8 = vector.broadcast %4 : vector<16x1xf32> to vector<16x64xf32>
    %9 = arith.addf %7, %8 : vector<16x64xf32>
    %cst_8 = arith.constant 0.000000e+00 : f32
    %10 = vector.broadcast %cst_8 : f32 to vector<16x64xf32>
    %11 = arith.maximumf %9, %10 : vector<16x64xf32>
    %12 = arith.truncf %11 : vector<16x64xf32> to vector<16x64xbf16>
    %c0_9 = arith.constant 0 : index
    %c0_10 = arith.constant 0 : index
    %13 = vector.load %arg6[%c0_9, %c0_10] : memref<32x16xbf16, #tpu.memory_space<vmem>>, vector<32x16xbf16>
    %c0_11 = arith.constant 0 : index
    %c0_12 = arith.constant 0 : index
    %14 = vector.load %arg7[%c0_11, %c0_12] : memref<32x1xf32, #tpu.memory_space<vmem>>, vector<32x1xf32>
    %c0_13 = arith.constant 0 : index
    %c0_14 = arith.constant 0 : index
    %15 = vector.load %arg8[%c0_13, %c0_14] : memref<32x1xf32, #tpu.memory_space<vmem>>, vector<32x1xf32>
    %cst_15 = arith.constant dense<0.000000e+00> : vector<32x64xf32>
    %16 = tpu.matmul %13, %12, %cst_15 {dimension_numbers = #tpu.dot_dimension_numbers<[1], [0], [0], [1], [0, 0, 1, 1], [], []>} : vector<32x16xbf16>, vector<16x64xbf16>, vector<32x64xf32> -> vector<32x64xf32>
    %17 = vector.broadcast %14 : vector<32x1xf32> to vector<32x64xf32>
    %18 = arith.mulf %16, %17 : vector<32x64xf32>
    %19 = vector.broadcast %15 : vector<32x1xf32> to vector<32x64xf32>
    %20 = arith.addf %18, %19 : vector<32x64xf32>
    %cst_16 = arith.constant 0.000000e+00 : f32
    %21 = vector.broadcast %cst_16 : f32 to vector<32x64xf32>
    %22 = arith.maximumf %20, %21 : vector<32x64xf32>
    %23 = vector.shape_cast %22 : vector<32x64xf32> to vector<32x8x8xf32>
    %cst_17 = arith.constant dense<0xFF800000> : vector<32x8xf32>
    %24 = vector.multi_reduction <maximumf>, %23, %cst_17 [2] : vector<32x8x8xf32> to vector<32x8xf32>
    %c0_18 = arith.constant 0 : index
    %c0_19 = arith.constant 0 : index
    %c0_20 = arith.constant 0 : index
    %25 = vector.load %arg9[%c0_18, %c0_19, %c0_20] : memref<1x32x8xf32, #tpu.memory_space<vmem>>, vector<1x32x8xf32>
    %26 = vector.shape_cast %25 : vector<1x32x8xf32> to vector<32x8xf32>
    %27 = vector.shape_cast %24 : vector<32x8xf32> to vector<1x32x8xf32>
    tpu.vector_store %arg9[%c0_18, %c0_19, %c0_20], %27 {strides = array<i32>} : memref<1x32x8xf32, #tpu.memory_space<vmem>>, vector<1x32x8xf32>,
    return
  }
  func.func @transform_0(%arg0: i32, %arg1: i32) -> (i32, i32, i32) {
    %c0_i32 = arith.constant 0 : i32
    %c0_i32_0 = arith.constant 0 : i32
    return %arg0, %c0_i32, %arg1 : i32, i32, i32
  }
  func.func @transform_1(%arg0: i32, %arg1: i32) -> (i32, i32) {
    %c0_i32 = arith.constant 0 : i32
    %c0_i32_0 = arith.constant 0 : i32
    %c0_i32_1 = arith.constant 0 : i32
    return %c0_i32, %c0_i32_0 : i32, i32
  }
  func.func @transform_2(%arg0: i32, %arg1: i32) -> (i32, i32) {
    %c0_i32 = arith.constant 0 : i32
    %c0_i32_0 = arith.constant 0 : i32
    %c0_i32_1 = arith.constant 0 : i32
    return %c0_i32, %c0_i32_0 : i32, i32
  }
  func.func @transform_3(%arg0: i32, %arg1: i32) -> (i32, i32) {
    %c0_i32 = arith.constant 0 : i32
    %c0_i32_0 = arith.constant 0 : i32
    %c0_i32_1 = arith.constant 0 : i32
    return %c0_i32, %c0_i32_0 : i32, i32
  }
  func.func @transform_4(%arg0: i32, %arg1: i32) -> (i32, i32) {
    %c0_i32 = arith.constant 0 : i32
    %c0_i32_0 = arith.constant 0 : i32
    %c0_i32_1 = arith.constant 0 : i32
    return %c0_i32, %c0_i32_0 : i32, i32
  }
  func.func @transform_5(%arg0: i32, %arg1: i32) -> (i32, i32) {
    %c0_i32 = arith.constant 0 : i32
    %c0_i32_0 = arith.constant 0 : i32
    %c0_i32_1 = arith.constant 0 : i32
    return %c0_i32, %c0_i32_0 : i32, i32
  }
  func.func @transform_6(%arg0: i32, %arg1: i32) -> (i32, i32) {
    %c0_i32 = arith.constant 0 : i32
    %c0_i32_0 = arith.constant 0 : i32
    %c0_i32_1 = arith.constant 0 : i32
    return %c0_i32, %c0_i32_0 : i32, i32
  }
  func.func @transform_7(%arg0: i32, %arg1: i32) -> (i32, i32, i32) {
    %c0_i32 = arith.constant 0 : i32
    %c0_i32_0 = arith.constant 0 : i32
    return %arg0, %c0_i32, %arg1 : i32, i32, i32
  }
}

module attributes {stable_mosaic.version = 11 : i64} {
  func.func @_msg_mlp_kernel(%arg0: i32, %arg1: i32, %arg2: memref<1x7x128xbf16, #tpu.memory_space<vmem>>, %arg3: memref<16x7xbf16, #tpu.memory_space<vmem>>, %arg4: memref<16x1xf32, #tpu.memory_space<vmem>>, %arg5: memref<16x1xf32, #tpu.memory_space<vmem>>, %arg6: memref<32x16xbf16, #tpu.memory_space<vmem>>, %arg7: memref<32x1xf32, #tpu.memory_space<vmem>>, %arg8: memref<32x1xf32, #tpu.memory_space<vmem>>, %arg9: memref<1x32x8xf32, #tpu.memory_space<vmem>>) attributes {dimension_semantics = [#tpu.dimension_semantics<parallel>, #tpu.dimension_semantics<parallel>], iteration_bounds = array<i64: 2, 1>, scalar_prefetch = 0 : i64, scratch_operands = 0 : i64, tpu.core_type = #tpu.core_type<tc>, window_params = [{transform_indices = @transform_0, window_bounds = array<i64: 1, 7, 128>}, {pipeline_mode = #tpu.pipeline_mode<synchronous>, transform_indices = @transform_1, window_bounds = array<i64: 16, 7>}, {pipeline_mode = #tpu.pipeline_mode<synchronous>, transform_indices = @transform_2, window_bounds = array<i64: 16, 1>}, {pipeline_mode = #tpu.pipeline_mode<synchronous>, transform_indices = @transform_3, window_bounds = array<i64: 16, 1>}, {pipeline_mode = #tpu.pipeline_mode<synchronous>, transform_indices = @transform_4, window_bounds = array<i64: 32, 16>}, {pipeline_mode = #tpu.pipeline_mode<synchronous>, transform_indices = @transform_5, window_bounds = array<i64: 32, 1>}, {pipeline_mode = #tpu.pipeline_mode<synchronous>, transform_indices = @transform_6, window_bounds = array<i64: 32, 1>}, {transform_indices = @transform_7, window_bounds = array<i64: 1, 32, 8>}]} {
    %c0 = arith.constant 0 : index
    %c0_0 = arith.constant 0 : index
    %c0_1 = arith.constant 0 : index
    %0 = vector.load %arg2[%c0, %c0_0, %c0_1] : memref<1x7x128xbf16, #tpu.memory_space<vmem>>, vector<1x7x128xbf16>
    %1 = vector.shape_cast %0 : vector<1x7x128xbf16> to vector<7x128xbf16>
    %c0_2 = arith.constant 0 : index
    %c0_3 = arith.constant 0 : index
    %2 = vector.load %arg3[%c0_2, %c0_3] : memref<16x7xbf16, #tpu.memory_space<vmem>>, vector<16x7xbf16>
    %c0_4 = arith.constant 0 : index
    %c0_5 = arith.constant 0 : index
    %3 = vector.load %arg4[%c0_4, %c0_5] : memref<16x1xf32, #tpu.memory_space<vmem>>, vector<16x1xf32>
    %c0_6 = arith.constant 0 : index
    %c0_7 = arith.constant 0 : index
    %4 = vector.load %arg5[%c0_6, %c0_7] : memref<16x1xf32, #tpu.memory_space<vmem>>, vector<16x1xf32>
    %cst = arith.constant dense<0.000000e+00> : vector<16x128xf32>
    %5 = tpu.matmul %2, %1, %cst {dimension_numbers = #tpu.dot_dimension_numbers<[1], [0], [0], [1], [0, 0, 1, 1], [], []>} : vector<16x7xbf16>, vector<7x128xbf16>, vector<16x128xf32> -> vector<16x128xf32>
    %6 = vector.broadcast %3 : vector<16x1xf32> to vector<16x128xf32>
    %7 = arith.mulf %5, %6 : vector<16x128xf32>
    %8 = vector.broadcast %4 : vector<16x1xf32> to vector<16x128xf32>
    %9 = arith.addf %7, %8 : vector<16x128xf32>
    %cst_8 = arith.constant 0.000000e+00 : f32
    %10 = vector.broadcast %cst_8 : f32 to vector<16x128xf32>
    %11 = arith.maximumf %9, %10 : vector<16x128xf32>
    %12 = arith.truncf %11 : vector<16x128xf32> to vector<16x128xbf16>
    %c0_9 = arith.constant 0 : index
    %c0_10 = arith.constant 0 : index
    %13 = vector.load %arg6[%c0_9, %c0_10] : memref<32x16xbf16, #tpu.memory_space<vmem>>, vector<32x16xbf16>
    %c0_11 = arith.constant 0 : index
    %c0_12 = arith.constant 0 : index
    %14 = vector.load %arg7[%c0_11, %c0_12] : memref<32x1xf32, #tpu.memory_space<vmem>>, vector<32x1xf32>
    %c0_13 = arith.constant 0 : index
    %c0_14 = arith.constant 0 : index
    %15 = vector.load %arg8[%c0_13, %c0_14] : memref<32x1xf32, #tpu.memory_space<vmem>>, vector<32x1xf32>
    %cst_15 = arith.constant dense<0.000000e+00> : vector<32x128xf32>
    %16 = tpu.matmul %13, %12, %cst_15 {dimension_numbers = #tpu.dot_dimension_numbers<[1], [0], [0], [1], [0, 0, 1, 1], [], []>} : vector<32x16xbf16>, vector<16x128xbf16>, vector<32x128xf32> -> vector<32x128xf32>
    %17 = vector.broadcast %14 : vector<32x1xf32> to vector<32x128xf32>
    %18 = arith.mulf %16, %17 : vector<32x128xf32>
    %19 = vector.broadcast %15 : vector<32x1xf32> to vector<32x128xf32>
    %20 = arith.addf %18, %19 : vector<32x128xf32>
    %cst_16 = arith.constant 0.000000e+00 : f32
    %21 = vector.broadcast %cst_16 : f32 to vector<32x128xf32>
    %22 = arith.maximumf %20, %21 : vector<32x128xf32>
    %23 = vector.shape_cast %22 : vector<32x128xf32> to vector<32x8x16xf32>
    %cst_17 = arith.constant dense<0xFF800000> : vector<32x8xf32>
    %24 = vector.multi_reduction <maximumf>, %23, %cst_17 [2] : vector<32x8x16xf32> to vector<32x8xf32>
    %c0_18 = arith.constant 0 : index
    %c0_19 = arith.constant 0 : index
    %c0_20 = arith.constant 0 : index
    %25 = vector.load %arg9[%c0_18, %c0_19, %c0_20] : memref<1x32x8xf32, #tpu.memory_space<vmem>>, vector<1x32x8xf32>
    %26 = vector.shape_cast %25 : vector<1x32x8xf32> to vector<32x8xf32>
    %27 = vector.shape_cast %24 : vector<32x8xf32> to vector<1x32x8xf32>
    tpu.vector_store %arg9[%c0_18, %c0_19, %c0_20], %27 {strides = array<i32>} : memref<1x32x8xf32, #tpu.memory_space<vmem>>, vector<1x32x8xf32>,
    return
  }
  func.func @transform_0(%arg0: i32, %arg1: i32) -> (i32, i32, i32) {
    %c0_i32 = arith.constant 0 : i32
    %c0_i32_0 = arith.constant 0 : i32
    return %arg0, %c0_i32, %arg1 : i32, i32, i32
  }
  func.func @transform_1(%arg0: i32, %arg1: i32) -> (i32, i32) {
    %c0_i32 = arith.constant 0 : i32
    %c0_i32_0 = arith.constant 0 : i32
    %c0_i32_1 = arith.constant 0 : i32
    return %c0_i32, %c0_i32_0 : i32, i32
  }
  func.func @transform_2(%arg0: i32, %arg1: i32) -> (i32, i32) {
    %c0_i32 = arith.constant 0 : i32
    %c0_i32_0 = arith.constant 0 : i32
    %c0_i32_1 = arith.constant 0 : i32
    return %c0_i32, %c0_i32_0 : i32, i32
  }
  func.func @transform_3(%arg0: i32, %arg1: i32) -> (i32, i32) {
    %c0_i32 = arith.constant 0 : i32
    %c0_i32_0 = arith.constant 0 : i32
    %c0_i32_1 = arith.constant 0 : i32
    return %c0_i32, %c0_i32_0 : i32, i32
  }
  func.func @transform_4(%arg0: i32, %arg1: i32) -> (i32, i32) {
    %c0_i32 = arith.constant 0 : i32
    %c0_i32_0 = arith.constant 0 : i32
    %c0_i32_1 = arith.constant 0 : i32
    return %c0_i32, %c0_i32_0 : i32, i32
  }
  func.func @transform_5(%arg0: i32, %arg1: i32) -> (i32, i32) {
    %c0_i32 = arith.constant 0 : i32
    %c0_i32_0 = arith.constant 0 : i32
    %c0_i32_1 = arith.constant 0 : i32
    return %c0_i32, %c0_i32_0 : i32, i32
  }
  func.func @transform_6(%arg0: i32, %arg1: i32) -> (i32, i32) {
    %c0_i32 = arith.constant 0 : i32
    %c0_i32_0 = arith.constant 0 : i32
    %c0_i32_1 = arith.constant 0 : i32
    return %c0_i32, %c0_i32_0 : i32, i32
  }
  func.func @transform_7(%arg0: i32, %arg1: i32) -> (i32, i32, i32) {
    %c0_i32 = arith.constant 0 : i32
    %c0_i32_0 = arith.constant 0 : i32
    return %arg0, %c0_i32, %arg1 : i32, i32, i32
  }
}

</mosaic_0001>

<bundles_post_ra>
// kernel: custom-call.12
= control target key start
LH: loop header
LB: loop body
LE: loop exit
PB: predicated region body
PF: predicated region fallthrough
CT: control target
= control target key end

     0   :  { %s6_s0 = inlined_call_operand.vmem [shape: f32[2,32], index: 0, kind: output, shape index: {}]  }

// kernel: pointnet_sa_msg_forward.2
= control target key start
LH: loop header
LB: loop body
LE: loop exit
PB: predicated region body
PF: predicated region fallthrough
CT: control target
= control target key end

     0   :  { %s1438_s24 = smov 0   ;;  %s1440_s25 = smov 0   ;;  %s1952_s0 = inlined_call_operand.vmem [shape: bf16[2,7,64], index: 0, kind: input, shape index: {}]   ;;  %s1953_s1 = inlined_call_operand.vmem [shape: bf16[16,7], index: 1, kind: input, shape index: {}]   ;;  %s1954_s2 = inlined_call_operand.vmem [shape: f32[16,1], index: 2, kind: input, shape index: {}]   ;;  %s1955_s3 = inlined_call_operand.vmem [shape: f32[16,1], index: 3, kind: input, shape index: {}]   ;;  %s1956_s4 = inlined_call_operand.vmem [shape: bf16[32,16], index: 4, kind: input, shape index: {}]   ;;  %s1957_s5 = inlined_call_operand.vmem [shape: f32[32,1], index: 5, kind: input, shape index: {}]   ;;  %s1958_s6 = inlined_call_operand.vmem [shape: f32[32,1], index: 6, kind: input, shape index: {}]   ;;  %s1959_s7 = inlined_call_operand.vmem [shape: f32[2,32,8], index: 7, kind: output, shape index: {}]  }
   0x1   :  { %s1442_s26 = smov 0  }
   0x2 LB: > { %s29_s27 = sadd.s32 1, %s1381_s25  ;;  %p1299_p0 = scmp.ge.s32.totalorder %s1385_s26, 1  ;;  %s1385_s26 = sphi %s1442_s26, %s17_s26   ;;  %s1381_s25 = sphi %s1440_s25, %s1961_s25   ;;  %s1377_s24 = sphi %s1438_s24, %s1960_s24  }
   0x3   : > { %p31_p1 = scmp.ge.s32.totalorder %s29_s27, 2  ;;  %p255_p2 = scmp.lt.s32.totalorder %s1385_s26, 3 }
   0x5   : > { %s1963_s27 = smov (%p31_p1, %s29_s27), 0  ;;  %p256_p3 = pnand %p1299_p0, %p255_p2 }
   0x6   : > { %p292_p4 = scmp.lt.s32.totalorder (!%p256_p3), %s1377_s24, 1  ;;  %s1389_s20 = smov (!%p256_p3), 104  }
   0x7   : > { %259 = sbr.rel (%p256_p3) target bundleno = 648 (0x288), region = 48  ;;  %s1390_s21 = smov (!%p256_p3), 112  }
   0x8   : > { %s1391_s22 = smov (!%p256_p3), 120   ;;  %s1392_s23 = smov (!%p256_p3), 80  }
   0x9   : > { %s1393_s28 = smov (!%p256_p3), 88   ;;  %s1394_s29 = smov (!%p256_p3), 96  }
   0xa   : > { %s1395_s30 = smov (!%p256_p3), 72  }
   0xc   : > { %v313_v0 = vld [vmem:[%s1955_s3] sm:$0xff]  ;;  %vm324_vm0 = vcmask 1042432   ;;  %v1387_v2 = vmov 0   ;;  %vm325_vm1 = vcmask 1043456   ;;  %s1965_s24 = smov (!%p292_p4, %s1377_s24), 1  ;;  %v1388_v3 = vmov 65535  }
   0xd   : > { %v311_v1 = vld [vmem:[%s1954_s2] sm:$0xff]  ;;  %1361 = vset.pattern.permute.xlu1 %v1387_v2  ;;  %1360 = vset.pattern.permute.xlu0 %v1387_v2  ;;  %v326_v4 = vsel %vm324_vm0, 4294967295, %v1388_v3  ;;  %s1300_s9 = sshll.u32 %s1965_s24, 2  ;;  %v314_v8 = vld [vmem:[%s1955_s3 + $0x8] sm:$0xff]  ;;  %vm320_vm2 = vcmask 56320   ;;  %v379_v11 = vld [vmem:[%s1957_s5 + $0x18] sm:$0xff] }
   0xe   : > { %359 = vperm.xlu1 %1361, %v313_v0   ;;  %347 = vperm.xlu0 %1360, %v311_v1   ;;  %v327_v5 = vsel %vm325_vm1, %v326_v4, 0  ;;  %s298_s12 = scalar_lea.vmem %s1952_s0, %s1300_s9  ;;  %v312_v9 = vld [vmem:[%s1954_s2 + $0x8] sm:$0xff]  ;;  %v1321_v10 = vld [vmem:[%s1953_s1] sm:$0xff]  ;;  %v378_v12 = vld [vmem:[%s1957_s5 + $0x10] sm:$0xff]  ;;  %vm394_vm3 = vcmask 130048   ;;  %vm561_vm4 = vcmask 1047556  }
   0xf   : > { %1362 = vset.pattern.permute.xlu2 %v1387_v2  ;;  %v308_v6 = vld [vmem:[%s298_s12] sm:$0xf]  ;;  %v382_v13 = vld [vmem:[%s1958_s6 + $0x10] sm:$0xff]  ;;  %v381_v14 = vld [vmem:[%s1958_s6 + $0x8] sm:$0xff]  ;;  %v1396_v60 = vmov 1983009808  }
  0x10   : > { %v329_v7 = vand.u32 %v327_v5, %v308_v6  ;;  %v376_v15 = vld [vmem:[%s1957_s5] sm:$0xff]  ;;  %v377_v16 = vld [vmem:[%s1957_s5 + $0x8] sm:$0xff]  ;;  %v383_v21 = vld [vmem:[%s1958_s6 + $0x18] sm:$0xff]  ;;  %v566_v61 = vunpack.c.l.s4 %v1396_v60  ;;  %vm1009_vm5 = vcmask 64512   ;;  %vm1172_vm6 = vcmask 1041409   ;;  %s1320_s8 = sshll.u32 %s1965_s24, 5 }
  0x11   : > { %422 = vperm.xlu2 %1362, %v376_v15   ;;  %v380_v17 = vld [vmem:[%s1958_s6] sm:$0xff]  ;;  %v1323_v33 = vld [vmem:[%s1956_s4 + $0x8] sm:$0xff]  ;;  %vm1174_vm7 = vcmask 1042434   ;;  %vm1176_vm8 = vcmask 1043459   ;;  %vm1178_vm9 = vcmask 1044484   ;;  %vm1180_vm10 = vcmask 1045509   ;;  %s1884_s11 = scalar_lea.vmem %s1959_s7, %s1320_s8 }
  0x12   : > { %338 = vmatpush.bf16.msra.mxu0 %v329_v7  ;;  %v1322_v32 = vld [vmem:[%s1956_s4] sm:$0xff]  ;;  %v1572_v1 = vunpack.c.0.s8 %v566_v61  ;;  %vm1182_vm11 = vcmask 1046534   ;;  %vm1184_vm12 = vcmask 1047559  }
  0x15   : > { %1307 = vmatmul.msk.bf16.vlgmr.msra.gmra.mxu0 %vm320_vm2, %v1321_v10 }
  0x16   : > { %364 = vperm.xlu1 %1361, %v314_v8   ;;  %352 = vperm.xlu0 %1360, %v312_v9  }
  0x19   : > { %427 = vperm.xlu2 %1362, %v377_v16  }
  0x1e   : > { %437 = vperm.xlu1 %1361, %v379_v11   ;;  %432 = vperm.xlu0 %1360, %v378_v12   ;;  %v1397_v12 = vmov 1934713408  }
  0x21   : > { %446 = vperm.xlu2 %1362, %v380_v17  }
  0x26   : > { %456 = vperm.xlu1 %1361, %v382_v13   ;;  %451 = vperm.xlu0 %1360, %v381_v14   ;;  %v614_v13 = vunpack.c.l.s4 %v1397_v12 }
  0x29   : > { %461 = vperm.xlu2 %1362, %v383_v21  }
  0x6b   : > { %v423_v34 = vpop.permute.xlu2 %422 }
  0x73   : > { %v428_v35 = vpop.permute.xlu2 %427 }
  0x7b   : > { %v447_v38 = vpop.permute.xlu2 %446 }
  0x80   : > { %v348_v18 = vpop.permute.xlu0 %347  ;;  %v360_v19 = vpop.permute.xlu1 %359 }
  0x83   : > { %v462_v55 = vpop.permute.xlu2 %461 }
  0x88   : > { %v353_v23 = vpop.permute.xlu0 %352  ;;  %v365_v27 = vpop.permute.xlu1 %364 }
  0x90   : > { %v438_v41 = vpop.permute.xlu1 %437  ;;  %v433_v43 = vpop.permute.xlu0 %432 }
  0x92   : > { %v340_v20 = vpop.f32.mrf.mxu0 }
  0x93   : > { %v355_v22 = vmul.f32 %v348_v18, %v340_v20 }
  0x95   : > { %v367_v25 = vadd.f32 %v360_v19, %v355_v22 }
  0x97   : > { %v369_v29 = vmax.f32 %v367_v25, 0.0 }
  0x98   : > { %v457_v45 = vpop.permute.xlu1 %456  ;;  %v452_v50 = vpop.permute.xlu0 %451 }
  0x9a   : > { %v342_v24 = vpop.f32.mrf.mxu0 }
  0x9b   : > { %v356_v26 = vmul.f32 %v353_v23, %v342_v24  ;;  %v1593_v23 = vunpack.c.0.s8 %v614_v13 }
  0x9d   : > { %v368_v28 = vadd.f32 %v365_v27, %v356_v26 }
  0x9f   : > { %v370_v30 = vmax.f32 %v368_v28, 0.0 }
  0xa1   : > { %v371_v31 = vpack.c.bf16 %v370_v30, %v369_v29 }
  0xa3   : > { %408 = vmatpush.bf16.msra.mxu1 %v371_v31  ;;  %1324 = vmatpush.bf16.msra.mxu2 %v371_v31 }
  0xa6   : > { %1316 = vmatmul.msk.bf16.vlgmr.msra.gmra.mxu1 %vm394_vm3, %v1322_v32  ;;  %1317 = vmatmul.msk.bf16.vlgmr.msra.gmra.mxu2 %vm394_vm3, %v1323_v33 }
 0x123   : > { %v410_v36 = vpop.f32.mrf.mxu1 }
 0x124   : > { %v440_v37 = vmul.f32 %v423_v34, %v410_v36 }
 0x126   : > { %v464_v39 = vadd.f32 %v447_v38, %v440_v37 }
 0x128   : > { %v1507_v40 = vmax.f32 %v464_v39, 0.0 }
 0x129   : > { %v415_v42 = vpop.f32.mrf.mxu2 }
 0x12a   : > { %500 = vrot.lane.b32.xlu2 %v1507_v40, %s1389_s20  ;;  %488 = vrot.lane.b32.xlu1 %v1507_v40, %s1390_s21  ;;  %v442_v44 = vmul.f32 %v433_v43, %v415_v42  ;;  %v563_v0 = vrot.slane %v1507_v40, 4 }
 0x12b   : > { %476 = vrot.lane.b32.xlu0 %v1507_v40, %s1391_s22  ;;  %v412_v48 = vpop.f32.mrf.mxu1 }
 0x12c   : > { %v466_v46 = vadd.f32 %v457_v45, %v442_v44  ;;  %v441_v49 = vmul.f32 %v428_v35, %v412_v48 }
 0x12e   : > { %v1521_v47 = vmax.f32 %v466_v46, 0.0  ;;  %v465_v51 = vadd.f32 %v452_v50, %v441_v49 }
 0x130   : > { %v1535_v52 = vmax.f32 %v465_v51, 0.0 }
 0x131   : > { %v417_v53 = vpop.f32.mrf.mxu2 }
 0x132   : > { %536 = vrot.lane.b32.xlu2 %v1507_v40, %s1392_s23  ;;  %524 = vrot.lane.b32.xlu1 %v1507_v40, %s1393_s28  ;;  %v443_v54 = vmul.f32 %v438_v41, %v417_v53 }
 0x133   : > { %512 = vrot.lane.b32.xlu0 %v1507_v40, %s1394_s29 }
 0x134   : > { %v467_v56 = vadd.f32 %v462_v55, %v443_v54 }
 0x136   : > { %v1555_v57 = vmax.f32 %v467_v56, 0.0 }
 0x13a   : > { %480 = vrot.lane.b32.xlu2 %v1521_v47, %s1391_s22  ;;  %504 = vrot.lane.b32.xlu1 %v1521_v47, %s1389_s20 }
 0x13b   : > { %548 = vrot.lane.b32.xlu0 %v1507_v40, %s1395_s30 }
 0x142   : > { %516 = vrot.lane.b32.xlu2 %v1521_v47, %s1394_s29  ;;  %540 = vrot.lane.b32.xlu1 %v1521_v47, %s1392_s23 }
 0x143   : > { %492 = vrot.lane.b32.xlu0 %v1521_v47, %s1390_s21 }
 0x14a   : > { %552 = vrot.lane.b32.xlu2 %v1521_v47, %s1395_s30  ;;  %478 = vrot.lane.b32.xlu1 %v1535_v52, %s1391_s22 }
 0x14b   : > { %528 = vrot.lane.b32.xlu0 %v1521_v47, %s1393_s28 }
 0x152   : > { %490 = vrot.lane.b32.xlu2 %v1535_v52, %s1390_s21  ;;  %514 = vrot.lane.b32.xlu1 %v1535_v52, %s1394_s29 }
 0x153   : > { %502 = vrot.lane.b32.xlu0 %v1535_v52, %s1389_s20 }
 0x15a   : > { %526 = vrot.lane.b32.xlu2 %v1535_v52, %s1393_s28  ;;  %550 = vrot.lane.b32.xlu1 %v1535_v52, %s1395_s30 }
 0x15b   : > { %538 = vrot.lane.b32.xlu0 %v1535_v52, %s1392_s23 }
 0x162   : > { %506 = vrot.lane.b32.xlu2 %v1555_v57, %s1389_s20  ;;  %494 = vrot.lane.b32.xlu1 %v1555_v57, %s1390_s21 }
 0x163   : > { %482 = vrot.lane.b32.xlu0 %v1555_v57, %s1391_s22 }
 0x16a   : > { %542 = vrot.lane.b32.xlu2 %v1555_v57, %s1392_s23  ;;  %530 = vrot.lane.b32.xlu1 %v1555_v57, %s1393_s28 }
 0x16b   : > { %518 = vrot.lane.b32.xlu0 %v1555_v57, %s1394_s29 }
 0x173   : > { %554 = vrot.lane.b32.xlu0 %v1555_v57, %s1395_s30 }
 0x184   : > { %v501_v58 = vpop.permute.xlu2 %500 }
 0x185   : > { %v573_v9 = vrot.slane %v501_v58, 4 }
 0x18c   : > { %v537_v59 = vpop.permute.xlu2 %536 }
 0x18d   : > { %v585_v17 = vrot.slane %v537_v59, 4 }
 0x194   : > { %v1574_v2 = vpop.permute.xlu2 %480 }
 0x19c   : > { %v489_v62 = vpop.permute.xlu1 %488  ;;  %v1589_v20 = vpop.permute.xlu2 %516 }
 0x19d   : > { %v477_v63 = vpop.permute.xlu0 %476  ;;  %v564_v3 = vsel %vm561_vm4, %v489_v62, %v563_v0  ;;  %v560_v6 = vrot.slane %v489_v62, 4 }
 0x19e   : > { %v575_v4 = vrot.slane %v477_v63, 4  ;;  %v1578_v5 = vperm.slane %v564_v3, %v1572_v1  ;;  %v574_v15 = vsel %vm561_vm4, %v573_v9, %v477_v63 }
 0x19f   : > { %v562_v18 = vsel %vm561_vm4, %v560_v6, %v1507_v40  ;;  %v580_v21 = vperm.slane %v574_v15, %v1572_v1 }
 0x1a0   : > { %v576_v7 = vsel %vm561_vm4, %v501_v58, %v575_v4  ;;  %v623_v14 = vrot.slane %v1578_v5, 4  ;;  %v568_v24 = vperm.slane %v562_v18, %v1572_v1 }
 0x1a1   : > { %v1584_v16 = vperm.slane %v576_v7, %v1572_v1  ;;  %v609_v31 = vrot.slane %v580_v21, 4 }
 0x1a2   : > { %v611_v35 = vrot.slane %v568_v24, 4 }
 0x1a3   : > { %v624_v26 = vsel %vm561_vm4, %v1584_v16, %v623_v14  ;;  %v610_v44 = vsel %vm561_vm4, %v609_v31, %v568_v24  ;;  %v621_v62 = vrot.slane %v1584_v16, 4 }
 0x1a4   : > { %v525_v8 = vpop.permute.xlu1 %524  ;;  %v632_v34 = vperm.slane %v624_v26, %v1593_v23  ;;  %v612_v46 = vsel %vm561_vm4, %v580_v21, %v611_v35  ;;  %v1612_v49 = vpop.permute.xlu2 %552  ;;  %v616_v58 = vperm.slane %v610_v44, %v1593_v23  ;;  %v675_v35 = vrot.slane %v1535_v52, 4 }
 0x1a5   : > { %v513_v10 = vpop.permute.xlu0 %512  ;;  %v599_v27 = vrot.slane %v525_v8, 4  ;;  %v821_v14 = vrot.slane %v1612_v49, 4 }
 0x1a6   : > { %v587_v11 = vrot.slane %v513_v10, 4  ;;  %v586_v22 = vsel %vm561_vm4, %v585_v17, %v513_v10  ;;  %v671_v43 = vrot.slane %v632_v34, 4 }
 0x1a7   : > { %v592_v29 = vperm.slane %v586_v22, %v1572_v1  ;;  %v622_v22 = vsel %vm561_vm4, %v621_v62, %v1578_v5  ;;  %v811_v5 = vrot.slane %v1589_v20, 4 }
 0x1a8   : > { %v588_v19 = vsel %vm561_vm4, %v537_v59, %v587_v11  ;;  %v620_v59 = vperm.slane %v612_v46, %v1593_v23 }
 0x1a9   : > { %v596_v25 = vperm.slane %v588_v19, %v1572_v1  ;;  %v635_v39 = vrot.slane %v592_v29, 4 }
 0x1ab   : > { %v647_v36 = vrot.slane %v596_v25, 4 }
 0x1ac   : > { %v1599_v28 = vpop.permute.xlu1 %504  ;;  %v1642_v24 = vpop.permute.xlu2 %490 }
 0x1ad   : > { %v549_v30 = vpop.permute.xlu0 %548  ;;  %v797_v63 = vrot.slane %v1599_v28, 4 }
 0x1ae   : > { %v597_v32 = vrot.slane %v549_v30, 4  ;;  %v600_v33 = vsel %vm561_vm4, %v549_v30, %v599_v27 }
 0x1af   : > { %v608_v37 = vperm.slane %v600_v33, %v1572_v1  ;;  %v798_v15 = vsel %vm561_vm4, %v797_v63, %v1574_v2 }
 0x1b0   : > { %v598_v38 = vsel %vm561_vm4, %v597_v32, %v525_v8  ;;  %v659_v8 = vrot.slane %v616_v58, 4  ;;  %v804_v30 = vperm.slane %v798_v15, %v1572_v1  ;;  %v663_v32 = vrot.slane %v620_v59, 4 }
 0x1b1   : > { %v604_v40 = vperm.slane %v598_v38, %v1572_v1  ;;  %v648_v41 = vsel %vm561_vm4, %v608_v37, %v647_v36  ;;  %v645_v50 = vrot.slane %v608_v37, 4  ;;  %v628_v37 = vperm.slane %v622_v22, %v1593_v23 }
 0x1b2   : > { %v656_v42 = vperm.slane %v648_v41, %v1593_v23  ;;  %v676_v41 = vsel %vm561_vm4, %v1642_v24, %v675_v35 }
 0x1b3   : > { %v633_v45 = vrot.slane %v604_v40, 4  ;;  %v636_v48 = vsel %vm561_vm4, %v604_v40, %v635_v39  ;;  %v646_v3 = vsel %vm561_vm4, %v645_v50, %v596_v25 }
 0x1b4   : > { %v541_v51 = vpop.permute.xlu1 %540  ;;  %v672_v53 = vsel %vm561_vm4, %v656_v42, %v671_v43  ;;  %v644_v54 = vperm.slane %v636_v48, %v1593_v23  ;;  %v669_v10 = vrot.slane %v656_v42, 4  ;;  %v652_v13 = vperm.slane %v646_v3, %v1593_v23 }
 0x1b5   : > { %v1616_v55 = vpop.permute.xlu0 %492  ;;  %v1031_v56 = vsel %vm1009_vm5, %v672_v53, -inf  ;;  %v634_v61 = vsel %vm561_vm4, %v633_v45, %v592_v29  ;;  %v809_v9 = vrot.slane %v541_v51, 4  ;;  %v833_v43 = vrot.slane %v804_v30, 4 }
 0x1b6   : > { %1032 = vmax.xlane.f32.xlu1 %v1031_v56  ;;  %v661_v60 = vrot.slane %v644_v54, 4  ;;  %v785_v4 = vrot.slane %v1616_v55, 4  ;;  %v640_v7 = vperm.slane %v634_v61, %v1593_v23  ;;  %v670_v29 = vsel %vm561_vm4, %v669_v10, %v632_v34 }
 0x1b7   : > { %v810_v25 = vsel %vm561_vm4, %v809_v9, %v1589_v20  ;;  %v665_v33 = vrot.slane %v652_v13, 4  ;;  %v1028_v34 = vsel %vm1009_vm5, %v670_v29, -inf  ;;  %v664_v40 = vsel %vm561_vm4, %v644_v54, %v663_v32 }
 0x1b8   : > { %v662_v0 = vsel %vm561_vm4, %v661_v60, %v620_v59  ;;  %v660_v11 = vsel %vm561_vm4, %v640_v7, %v659_v8  ;;  %v657_v12 = vrot.slane %v640_v7, 4  ;;  %v786_v18 = vsel %vm561_vm4, %v785_v4, %v1521_v47  ;;  %v527_v7 = vpop.permute.xlu2 %526 }
 0x1b9   : > { %v1016_v6 = vsel %vm1009_vm5, %v662_v0, -inf  ;;  %v1013_v16 = vsel %vm1009_vm5, %v660_v11, -inf  ;;  %v792_v36 = vperm.slane %v786_v18, %v1572_v1  ;;  %v816_v38 = vperm.slane %v810_v25, %v1572_v1 }
 0x1ba   : > { %1017 = vmax.xlane.f32.xlu0 %v1016_v6  ;;  %1014 = vmax.xlane.f32.xlu2 %v1013_v16  ;;  %v658_v21 = vsel %vm561_vm4, %v657_v12, %v616_v58  ;;  %v812_v20 = vsel %vm561_vm4, %v541_v51, %v811_v5  ;;  %v666_v44 = vsel %vm561_vm4, %v665_v33, %v628_v37  ;;  %v1019_v50 = vsel %vm1009_vm5, %v664_v40, -inf }
 0x1bb   : > { %v1010_v27 = vsel %vm1009_vm5, %v658_v21, -inf  ;;  %v835_v46 = vrot.slane %v792_v36, 4  ;;  %v1667_v56 = vperm.slane %v676_v41, %v1572_v1  ;;  %v787_v58 = vrot.slane %v1521_v47, 4 }
 0x1bc   : > { %v1635_v17 = vpop.permute.xlu1 %478  ;;  %v834_v51 = vsel %vm561_vm4, %v833_v43, %v792_v36  ;;  %v1022_v62 = vsel %vm1009_vm5, %v666_v44, -inf  ;;  %v799_v0 = vrot.slane %v1574_v2, 4  ;;  %v820_v3 = vperm.slane %v812_v20, %v1572_v1 }
 0x1bd   : > { %v529_v19 = vpop.permute.xlu0 %528  ;;  %v687_v48 = vrot.slane %v1635_v17, 4  ;;  %v667_v4 = vrot.slane %v628_v37, 4  ;;  %v859_v6 = vrot.slane %v816_v38, 4  ;;  %v788_v47 = vsel %vm561_vm4, %v1616_v55, %v787_v58 }
 0x1be   : > { %v822_v26 = vsel %vm561_vm4, %v821_v14, %v529_v19  ;;  %1011 = vmax.xlane.f32.xlu1 %v1010_v27  ;;  %v823_v42 = vrot.slane %v529_v19, 4  ;;  %v840_v8 = vperm.slane %v834_v51, %v1593_v23  ;;  %v800_v9 = vsel %vm561_vm4, %v1599_v28, %v799_v0 }
 0x1bf   : > { %v828_v31 = vperm.slane %v822_v26, %v1572_v1  ;;  %v668_v11 = vsel %vm561_vm4, %v652_v13, %v667_v4  ;;  %v673_v12 = vrot.slane %v1642_v24, 4  ;;  %v735_v14 = vrot.slane %v1667_v56, 4 }
 0x1c0   : > { %v824_v60 = vsel %vm561_vm4, %v1612_v49, %v823_v42  ;;  %v836_v49 = vsel %vm561_vm4, %v804_v30, %v835_v46  ;;  %v871_v16 = vrot.slane %v820_v3, 4  ;;  %v796_v18 = vperm.slane %v788_v47, %v1572_v1 }
 0x1c1   : > { %v857_v39 = vrot.slane %v828_v31, 4  ;;  %v832_v10 = vperm.slane %v824_v60, %v1572_v1  ;;  %v860_v15 = vsel %vm561_vm4, %v828_v31, %v859_v6  ;;  %v711_v19 = vrot.slane %v527_v7, 4  ;;  %v1738_v6 = vpop.permute.xlu2 %506 }
 0x1c2   : > { %1029 = vmax.xlane.f32.xlu0 %v1028_v34  ;;  %1020 = vmax.xlane.f32.xlu2 %v1019_v50  ;;  %v844_v28 = vperm.slane %v836_v49, %v1593_v23  ;;  %v1025_v25 = vsel %vm1009_vm5, %v668_v11, -inf  ;;  %v883_v13 = vrot.slane %v840_v8, 4  ;;  %v868_v31 = vperm.slane %v860_v15, %v1593_v23 }
 0x1c3   : > { %v858_v45 = vsel %vm561_vm4, %v857_v39, %v816_v38  ;;  %v869_v27 = vrot.slane %v832_v10, 4  ;;  %v808_v36 = vperm.slane %v800_v9, %v1572_v1  ;;  %v872_v39 = vsel %vm561_vm4, %v832_v10, %v871_v16 }
 0x1c4   : > { %v515_v53 = vpop.permute.xlu1 %514  ;;  %v864_v54 = vperm.slane %v858_v45, %v1593_v23  ;;  %v887_v38 = vrot.slane %v844_v28, 4  ;;  %v847_v46 = vrot.slane %v796_v18, 4  ;;  %v1726_v58 = vperm.slane %v872_v39, %v1593_v23 }
 0x1c5   : > { %v503_v59 = vpop.permute.xlu0 %502  ;;  %v699_v22 = vrot.slane %v515_v53, 4  ;;  %v870_v45 = vsel %vm561_vm4, %v869_v27, %v820_v3  ;;  %v885_v4 = vrot.slane %v868_v31, 4 }
 0x1c6   : > { %v688_v61 = vsel %vm561_vm4, %v503_v59, %v687_v48  ;;  %v881_v63 = vrot.slane %v864_v54, 4  ;;  %1023 = vmax.xlane.f32.xlu1 %v1022_v62  ;;  %v685_v21 = vrot.slane %v503_v59, 4  ;;  %v884_v41 = vsel %vm561_vm4, %v864_v54, %v883_v13 }
 0x1c7   : > { %v1685_v2 = vperm.slane %v688_v61, %v1572_v1  ;;  %v876_v61 = vperm.slane %v870_v45, %v1593_v23  ;;  %v845_v62 = vrot.slane %v808_v36, 4  ;;  %v893_v10 = vrot.slane %v1726_v58, 4 }
 0x1c8   : > { %v882_v55 = vsel %vm561_vm4, %v881_v63, %v840_v8  ;;  %v686_v34 = vsel %vm561_vm4, %v685_v21, %v1635_v17  ;;  %v888_v17 = vsel %vm561_vm4, %v868_v31, %v887_v38  ;;  %v674_v63 = vsel %vm561_vm4, %v673_v12, %v1535_v52 }
 0x1c9   : > { %v736_v24 = vsel %vm561_vm4, %v1685_v2, %v735_v14  ;;  %v1058_v30 = vsel %vm1009_vm5, %v882_v55, -inf  ;;  %v692_v50 = vperm.slane %v686_v34, %v1572_v1  ;;  %v1067_v47 = vsel %vm1009_vm5, %v888_v17, -inf  ;;  %v543_v34 = vpop.permute.xlu2 %542 }
 0x1ca   : > { %1026 = vmax.xlane.f32.xlu2 %v1025_v25  ;;  %v1711_v42 = vperm.slane %v736_v24, %v1593_v23  ;;  %v848_v8 = vsel %vm561_vm4, %v808_v36, %v847_v46  ;;  %v846_v11 = vsel %vm561_vm4, %v845_v62, %v796_v18  ;;  %v680_v12 = vperm.slane %v674_v63, %v1572_v1 }
 0x1cb   : > { %v721_v49 = vrot.slane %v692_v50, 4  ;;  %v889_v14 = vrot.slane %v876_v61, 4  ;;  %v886_v16 = vsel %vm561_vm4, %v885_v4, %v844_v28  ;;  %v852_v21 = vperm.slane %v846_v11, %v1593_v23 }
 0x1cc   : > { %v551_v26 = vpop.permute.xlu1 %550  ;;  %v783_v60 = vrot.slane %v1711_v42, 4  ;;  %v1064_v13 = vsel %vm1009_vm5, %v886_v16, -inf  ;;  %v909_v28 = vrot.slane %v1738_v6, 4  ;;  %v733_v24 = vrot.slane %v1685_v2, 4 }
 0x1cd   : > { %v539_v29 = vpop.permute.xlu0 %538  ;;  %v709_v5 = vrot.slane %v551_v26, 4  ;;  %v712_v35 = vsel %vm561_vm4, %v551_v26, %v711_v19  ;;  %v1753_v19 = vperm.slane %v848_v8, %v1593_v23  ;;  %v722_v18 = vsel %vm561_vm4, %v721_v49, %v680_v12 }
 0x1ce   : > { %v697_v32 = vrot.slane %v539_v29, 4  ;;  %v700_v33 = vsel %vm561_vm4, %v539_v29, %v699_v22  ;;  %1059 = vmax.xlane.f32.xlu1 %v1058_v30  ;;  %v1716_v44 = vperm.slane %v712_v35, %v1572_v1  ;;  %v723_v26 = vrot.slane %v680_v12, 4 }
 0x1cf   : > { %v1703_v37 = vperm.slane %v700_v33, %v1572_v1  ;;  %v710_v48 = vsel %vm561_vm4, %v709_v5, %v527_v7  ;;  %v894_v22 = vsel %vm561_vm4, %v893_v10, %v1753_v19  ;;  %v890_v27 = vsel %vm561_vm4, %v889_v14, %v852_v21 }
 0x1d0   : > { %v698_v40 = vsel %vm561_vm4, %v697_v32, %v515_v53  ;;  %v1061_v53 = vsel %vm1009_vm5, %v884_v41, -inf  ;;  %v716_v0 = vperm.slane %v710_v48, %v1572_v1  ;;  %v757_v29 = vrot.slane %v1716_v44, 4 }
 0x1d1   : > { %v704_v43 = vperm.slane %v698_v40, %v1572_v1  ;;  %v759_v20 = vrot.slane %v1703_v37, 4  ;;  %v1076_v33 = vsel %vm1009_vm5, %v894_v22, -inf  ;;  %v724_v5 = vsel %vm561_vm4, %v692_v50, %v723_v26 }
 0x1d2   : > { %1062 = vmax.xlane.f32.xlu2 %v1061_v53  ;;  %v745_v15 = vrot.slane %v716_v0, 4  ;;  %v728_v35 = vperm.slane %v722_v18, %v1593_v23  ;;  %v1070_v2 = vsel %vm1009_vm5, %v890_v27, -inf  ;;  %v891_v38 = vrot.slane %v852_v21, 4 }
 0x1d3   : > { %v760_v54 = vsel %vm561_vm4, %v1716_v44, %v759_v20  ;;  %v747_v59 = vrot.slane %v704_v43, 4  ;;  %v732_v20 = vperm.slane %v724_v5, %v1593_v23  ;;  %v758_v44 = vsel %vm561_vm4, %v757_v29, %v1703_v37 }
 0x1d4   : > { %v1729_v51 = vperm.slane %v760_v54, %v1593_v23  ;;  %v1744_v9 = vpop.permute.xlu1 %494  ;;  %v746_v31 = vsel %vm561_vm4, %v745_v15, %v704_v43  ;;  %v892_v43 = vsel %vm561_vm4, %v876_v61, %v891_v38  ;;  %v771_v48 = vrot.slane %v728_v35, 4 }
 0x1d5   : > { %v1736_v3 = vpop.permute.xlu0 %482  ;;  %v748_v55 = vsel %vm561_vm4, %v716_v0, %v747_v59  ;;  %v897_v32 = vrot.slane %v1744_v9, 4  ;;  %v752_v40 = vperm.slane %v746_v31, %v1593_v23  ;;  %v734_v17 = vsel %vm561_vm4, %v733_v24, %v1667_v56 }
 0x1d6   : > { %v784_v7 = vsel %vm561_vm4, %v1729_v51, %v783_v60  ;;  %1068 = vmax.xlane.f32.xlu1 %v1067_v47  ;;  %v1759_v25 = vperm.slane %v748_v55, %v1593_v23  ;;  %v910_v36 = vsel %vm561_vm4, %v909_v28, %v1736_v3  ;;  %v921_v50 = vrot.slane %v543_v34, 4 }
 0x1d7   : > { %v1055_v52 = vsel %vm1009_vm5, %v784_v7, -inf  ;;  %v1782_v45 = vperm.slane %v910_v36, %v1572_v1  ;;  %v898_v46 = vsel %vm561_vm4, %v897_v32, %v1555_v57  ;;  %v1073_v59 = vsel %vm1009_vm5, %v892_v43, -inf }
 0x1d8   : > { %1056 = vmax.xlane.f32.xlu0 %v1055_v52  ;;  %v773_v39 = vrot.slane %v1759_v25, 4  ;;  %v772_v60 = vsel %vm561_vm4, %v752_v40, %v771_v48  ;;  %v764_v37 = vperm.slane %v758_v44, %v1593_v23  ;;  %v911_v61 = vrot.slane %v1736_v3, 4 }
 0x1d9   : > { %v1794_v62 = vperm.slane %v898_v46, %v1572_v1  ;;  %v769_v0 = vrot.slane %v752_v40, 4  ;;  %v740_v56 = vperm.slane %v734_v17, %v1593_v23  ;;  %v945_v4 = vrot.slane %v1782_v45, 4 }
 0x1da   : > { %1065 = vmax.xlane.f32.xlu2 %v1064_v13  ;;  %v774_v53 = vsel %vm561_vm4, %v773_v39, %v732_v20  ;;  %v1037_v52 = vsel %vm1009_vm5, %v772_v60, -inf  ;;  %v777_v12 = vrot.slane %v764_v37, 4  ;;  %v912_v16 = vsel %vm561_vm4, %v1738_v6, %v911_v61 }
 0x1db   : > { %v1040_v8 = vsel %vm1009_vm5, %v774_v53, -inf  ;;  %v770_v55 = vsel %vm561_vm4, %v769_v0, %v728_v35  ;;  %v779_v15 = vrot.slane %v740_v56, 4  ;;  %v946_v21 = vsel %vm561_vm4, %v945_v4, %v1794_v62 }
 0x1dc   : > { %v531_v41 = vpop.permute.xlu1 %530  ;;  %v1034_v28 = vsel %vm1009_vm5, %v770_v55, -inf  ;;  %v778_v24 = vsel %vm561_vm4, %v777_v12, %v740_v56  ;;  %v899_v29 = vrot.slane %v1555_v57, 4  ;;  %v952_v6 = vperm.slane %v946_v21, %v1593_v23 }
 0x1dd   : > { %v519_v30 = vpop.permute.xlu0 %518  ;;  %v935_v54 = vrot.slane %v531_v41, 4  ;;  %v780_v13 = vsel %vm561_vm4, %v764_v37, %v779_v15  ;;  %v920_v31 = vperm.slane %v912_v16, %v1572_v1  ;;  %v1046_v57 = vsel %vm1009_vm5, %v778_v24, -inf }
 0x1de   : > { %1077 = vmax.xlane.f32.xlu1 %v1076_v33  ;;  %v923_v49 = vrot.slane %v519_v30, 4  ;;  %v922_v3 = vsel %vm561_vm4, %v921_v50, %v519_v30  ;;  %v1049_v33 = vsel %vm1009_vm5, %v780_v13, -inf  ;;  %v900_v35 = vsel %vm561_vm4, %v1744_v9, %v899_v29 }
 0x1df   : > { %v928_v18 = vperm.slane %v922_v3, %v1572_v1  ;;  %v995_v40 = vrot.slane %v952_v6, 4  ;;  %v957_v43 = vrot.slane %v920_v31, 4  ;;  %v908_v44 = vperm.slane %v900_v35, %v1572_v1 }
 0x1e0   : > { %1071 = vmax.xlane.f32.xlu0 %v1070_v2  ;;  %v924_v22 = vsel %vm561_vm4, %v543_v34, %v923_v49  ;;  %v775_v2 = vrot.slane %v732_v20, 4  ;;  %v947_v9 = vrot.slane %v1794_v62, 4 }
 0x1e1   : > { %v932_v32 = vperm.slane %v924_v22, %v1572_v1  ;;  %v971_v36 = vrot.slane %v928_v18, 4  ;;  %v959_v53 = vrot.slane %v908_v44, 4 }
 0x1e2   : > { %1074 = vmax.xlane.f32.xlu2 %v1073_v59  ;;  %v776_v34 = vsel %vm561_vm4, %v1759_v25, %v775_v2  ;;  %v781_v25 = vrot.slane %v1729_v51, 4  ;;  %v948_v37 = vsel %vm561_vm4, %v1782_v45, %v947_v9 }
 0x1e3   : > { %v1043_v20 = vsel %vm1009_vm5, %v776_v34, -inf  ;;  %v983_v51 = vrot.slane %v932_v32, 4  ;;  %v956_v0 = vperm.slane %v948_v37, %v1593_v23  ;;  %v960_v56 = vsel %vm561_vm4, %v920_v31, %v959_v53 }
 0x1e4   : > { %v782_v62 = vsel %vm561_vm4, %v781_v25, %v1711_v42 }
 0x1e5   : > { %v555_v63 = vpop.permute.xlu0 %554 }
 0x1e6   : > { %v933_v47 = vrot.slane %v555_v63, 4  ;;  %v936_v7 = vsel %vm561_vm4, %v555_v63, %v935_v54  ;;  %1041 = vmax.xlane.f32.xlu1 %v1040_v8  ;;  %v968_v8 = vperm.slane %v960_v56, %v1593_v23 }
 0x1e7   : > { %v944_v11 = vperm.slane %v936_v7, %v1572_v1 }
 0x1e8   : > { %v934_v10 = vsel %vm561_vm4, %v933_v47, %v531_v41  ;;  %1038 = vmax.xlane.f32.xlu0 %v1037_v52  ;;  %v1052_v47 = vsel %vm1009_vm5, %v782_v62, -inf  ;;  %v999_v52 = vrot.slane %v956_v0, 4  ;;  %v1007_v12 = vrot.slane %v968_v8, 4 }
 0x1e9   : > { %v940_v14 = vperm.slane %v934_v10, %v1572_v1  ;;  %v981_v27 = vrot.slane %v944_v11, 4  ;;  %v958_v1 = vsel %vm561_vm4, %v957_v43, %v908_v44  ;;  %v984_v45 = vsel %vm561_vm4, %v944_v11, %v983_v51 }
 0x1ea   : > { %1035 = vmax.xlane.f32.xlu2 %v1034_v28  ;;  %v964_v63 = vperm.slane %v958_v1, %v1593_v23  ;;  %v992_v3 = vperm.slane %v984_v45, %v1593_v23 }
 0x1eb   : > { %v969_v26 = vrot.slane %v940_v14, 4  ;;  %v982_v39 = vsel %vm561_vm4, %v981_v27, %v932_v32  ;;  %v972_v41 = vsel %vm561_vm4, %v940_v14, %v971_v36 }
 0x1ec   : > { %v988_v48 = vperm.slane %v982_v39, %v1593_v23  ;;  %v980_v50 = vperm.slane %v972_v41, %v1593_v23  ;;  %v1003_v14 = vrot.slane %v964_v63, 4  ;;  %v1008_v55 = vsel %vm561_vm4, %v992_v3, %v1007_v12 }
 0x1ed   : > { %v970_v30 = vsel %vm561_vm4, %v969_v26, %v928_v18  ;;  %v1005_v16 = vrot.slane %v992_v3, 4  ;;  %v1103_v21 = vsel %vm1009_vm5, %v1008_v55, -inf  ;;  %v895_v18 = vrot.slane %v1753_v19, 4 }
 0x1ee   : > { %v976_v5 = vperm.slane %v970_v30, %v1593_v23  ;;  %1050 = vmax.xlane.f32.xlu1 %v1049_v33  ;;  %v1001_v60 = vrot.slane %v988_v48, 4  ;;  %v997_v61 = vrot.slane %v980_v50, 4  ;;  %v1000_v10 = vsel %vm561_vm4, %v980_v50, %v999_v52 }
 0x1ef   : > { %v1091_v11 = vsel %vm1009_vm5, %v1000_v10, -inf  ;;  %v1004_v15 = vsel %vm561_vm4, %v988_v48, %v1003_v14  ;;  %v1006_v23 = vsel %vm561_vm4, %v1005_v16, %v968_v8  ;;  %v896_v13 = vsel %vm561_vm4, %v1726_v58, %v895_v18 }
 0x1f0   : > { %1047 = vmax.xlane.f32.xlu0 %v1046_v57  ;;  %v993_v38 = vrot.slane %v976_v5, 4  ;;  %v996_v46 = vsel %vm561_vm4, %v976_v5, %v995_v40  ;;  %v1002_v4 = vsel %vm561_vm4, %v1001_v60, %v964_v63  ;;  %v998_v7 = vsel %vm561_vm4, %v997_v61, %v956_v0 }
 0x1f1   : > { %v1085_v54 = vsel %vm1009_vm5, %v996_v46, -inf  ;;  %v1094_v42 = vsel %vm1009_vm5, %v1002_v4, -inf  ;;  %v1088_v49 = vsel %vm1009_vm5, %v998_v7, -inf  ;;  %v1097_v22 = vsel %vm1009_vm5, %v1004_v15, -inf }
 0x1f2   : > { %v994_v17 = vsel %vm561_vm4, %v993_v38, %v952_v6  ;;  %1044 = vmax.xlane.f32.xlu2 %v1043_v20  ;;  %v1100_v26 = vsel %vm1009_vm5, %v1006_v23, -inf  ;;  %v1079_v27 = vsel %vm1009_vm5, %v896_v13, -inf  ;;  %v1138_v6 = vlaneseq }
 0x1f3   : > { %v1082_v59 = vsel %vm1009_vm5, %v994_v17, -inf }
 0x1f4   : > { %v1867_v31 = vand.u32 127, %v1138_v6 }
 0x1f6   : > { %1086 = vmax.xlane.f32.xlu1 %v1085_v54 }
 0x1f8   : > { %1083 = vmax.xlane.f32.xlu0 %v1082_v59 }
 0x1fa   : > { %1053 = vmax.xlane.f32.xlu2 %v1052_v47 }
 0x1fe   : > { %1095 = vmax.xlane.f32.xlu1 %v1094_v42 }
 0x200   : > { %1089 = vmax.xlane.f32.xlu0 %v1088_v49 }
 0x202   : > { %1092 = vmax.xlane.f32.xlu2 %v1091_v11 }
 0x206   : > { %1104 = vmax.xlane.f32.xlu1 %v1103_v21 }
 0x208   : > { %1098 = vmax.xlane.f32.xlu0 %v1097_v22 }
 0x20a   : > { %1101 = vmax.xlane.f32.xlu2 %v1100_v26 }
 0x210   : > { %1080 = vmax.xlane.f32.xlu0 %v1079_v27 }
 0x229   : > { %v1033_v28 = vpop.xlane.xlu1 %1032 }
 0x22a   : > { %v1147_v9 = vperm.slane %v1033_v28, %v1867_v31 }
 0x22d   : > { %v1015_v24 = vpop.xlane.xlu2 %1014  ;;  %v1018_v30 = vpop.xlane.xlu0 %1017 }
 0x22e   : > { %v1141_v5 = vperm.slane %v1015_v24, %v1867_v31  ;;  %v1142_v36 = vperm.slane %v1018_v30, %v1867_v31 }
 0x231   : > { %v1012_v29 = vpop.xlane.xlu1 %1011 }
 0x232   : > { %v1140_v19 = vperm.slane %v1012_v29, %v1867_v31 }
 0x234   : > { %v1173_v58 = vsel %vm1172_vm6, %v1141_v5, %v1140_v19 }
 0x235   : > { %v1021_v32 = vpop.xlane.xlu2 %1020  ;;  %v1030_v2 = vpop.xlane.xlu0 %1029  ;;  %v1175_v38 = vsel %vm1174_vm7, %v1142_v36, %v1173_v58 }
 0x236   : > { %v1143_v35 = vperm.slane %v1021_v32, %v1867_v31  ;;  %v1146_v41 = vperm.slane %v1030_v2, %v1867_v31 }
 0x238   : > { %v1177_v34 = vsel %vm1176_vm8, %v1143_v35, %v1175_v38 }
 0x239   : > { %v1024_v33 = vpop.xlane.xlu1 %1023 }
 0x23a   : > { %v1144_v57 = vperm.slane %v1024_v33, %v1867_v31 }
 0x23c   : > { %v1179_v43 = vsel %vm1178_vm9, %v1144_v57, %v1177_v34 }
 0x23d   : > { %v1027_v39 = vpop.xlane.xlu2 %1026 }
 0x23e   : > { %v1145_v40 = vperm.slane %v1027_v39, %v1867_v31 }
 0x240   : > { %v1181_v46 = vsel %vm1180_vm10, %v1145_v40, %v1179_v43 }
 0x241   : > { %v1060_v44 = vpop.xlane.xlu1 %1059  ;;  %v1183_v48 = vsel %vm1182_vm11, %v1146_v41, %v1181_v46 }
 0x242   : > { %v1185_v20 = vsel %vm1184_vm12, %v1147_v9, %v1183_v48  ;;  %v1156_v54 = vperm.slane %v1060_v44, %v1867_v31 }
 0x243   : > { %1211 = vst.msk [vmem:[%s1884_s11] sm:$0xff] %vm1009_vm5, %v1185_v20 }
 0x245   : > { %v1063_v17 = vpop.xlane.xlu2 %1062 }
 0x246   : > { %v1157_v53 = vperm.slane %v1063_v17, %v1867_v31 }
 0x248   : > { %v1193_v60 = vsel %vm1172_vm6, %v1157_v53, %v1156_v54 }
 0x249   : > { %v1069_v50 = vpop.xlane.xlu1 %1068 }
 0x24a   : > { %v1159_v37 = vperm.slane %v1069_v50, %v1867_v31 }
 0x24b   : > { %v1057_v25 = vpop.xlane.xlu0 %1056 }
 0x24c   : > { %v1155_v29 = vperm.slane %v1057_v25, %v1867_v31 }
 0x24d   : > { %v1066_v1 = vpop.xlane.xlu2 %1065 }
 0x24e   : > { %v1158_v59 = vperm.slane %v1066_v1, %v1867_v31 }
 0x250   : > { %v1194_v62 = vsel %vm1174_vm7, %v1158_v59, %v1193_v60 }
 0x251   : > { %v1078_v61 = vpop.xlane.xlu1 %1077  ;;  %v1195_v51 = vsel %vm1176_vm8, %v1159_v37, %v1194_v62 }
 0x252   : > { %v1162_v7 = vperm.slane %v1078_v61, %v1867_v31 }
 0x253   : > { %v1072_v63 = vpop.xlane.xlu0 %1071 }
 0x254   : > { %v1160_v0 = vperm.slane %v1072_v63, %v1867_v31 }
 0x255   : > { %v1075_v4 = vpop.xlane.xlu2 %1074 }
 0x256   : > { %v1196_v56 = vsel %vm1178_vm9, %v1160_v0, %v1195_v51  ;;  %v1161_v47 = vperm.slane %v1075_v4, %v1867_v31 }
 0x258   : > { %v1197_v8 = vsel %vm1180_vm10, %v1161_v47, %v1196_v56 }
 0x259   : > { %v1042_v45 = vpop.xlane.xlu1 %1041  ;;  %v1198_v49 = vsel %vm1182_vm11, %v1162_v7, %v1197_v8 }
 0x25a   : > { %v1150_v15 = vperm.slane %v1042_v45, %v1867_v31 }
 0x25b   : > { %v1039_v42 = vpop.xlane.xlu0 %1038 }
 0x25c   : > { %v1149_v14 = vperm.slane %v1039_v42, %v1867_v31 }
 0x25d   : > { %v1036_v52 = vpop.xlane.xlu2 %1035 }
 0x25e   : > { %v1148_v12 = vperm.slane %v1036_v52, %v1867_v31 }
 0x260   : > { %v1186_v55 = vsel %vm1172_vm6, %v1149_v14, %v1148_v12 }
 0x261   : > { %v1051_v3 = vpop.xlane.xlu1 %1050  ;;  %v1187_v21 = vsel %vm1174_vm7, %v1150_v15, %v1186_v55 }
 0x262   : > { %v1153_v27 = vperm.slane %v1051_v3, %v1867_v31 }
 0x263   : > { %v1048_v10 = vpop.xlane.xlu0 %1047 }
 0x264   : > { %v1152_v26 = vperm.slane %v1048_v10, %v1867_v31 }
 0x265   : > { %v1045_v11 = vpop.xlane.xlu2 %1044 }
 0x266   : > { %v1151_v16 = vperm.slane %v1045_v11, %v1867_v31 }
 0x268   : > { %v1188_v18 = vsel %vm1176_vm8, %v1151_v16, %v1187_v21 }
 0x269   : > { %v1087_v22 = vpop.xlane.xlu1 %1086  ;;  %v1189_v13 = vsel %vm1178_vm9, %v1152_v26, %v1188_v18 }
 0x26a   : > { %v1190_v6 = vsel %vm1180_vm10, %v1153_v27, %v1189_v13  ;;  %v1165_v35 = vperm.slane %v1087_v22, %v1867_v31 }
 0x26b   : > { %v1084_v23 = vpop.xlane.xlu0 %1083 }
 0x26c   : > { %v1164_v19 = vperm.slane %v1084_v23, %v1867_v31 }
 0x26d   : > { %v1054_v28 = vpop.xlane.xlu2 %1053 }
 0x26e   : > { %v1154_v24 = vperm.slane %v1054_v28, %v1867_v31  ;;  %v1200_v36 = vsel %vm1172_vm6, %v1165_v35, %v1164_v19 }
 0x270   : > { %v1191_v30 = vsel %vm1182_vm11, %v1154_v24, %v1190_v6 }
 0x271   : > { %v1192_v33 = vsel %vm1184_vm12, %v1155_v29, %v1191_v30  ;;  %v1096_v5 = vpop.xlane.xlu1 %1095 }
 0x272   : > { %1212 = vst.msk [vmem:[%s1884_s11 + $0x8] sm:$0xff] %vm1009_vm5, %v1192_v33  ;;  %v1168_v41 = vperm.slane %v1096_v5, %v1867_v31 }
 0x273   : > { %v1090_v32 = vpop.xlane.xlu0 %1089 }
 0x274   : > { %v1166_v58 = vperm.slane %v1090_v32, %v1867_v31 }
 0x275   : > { %v1093_v57 = vpop.xlane.xlu2 %1092 }
 0x276   : > { %v1201_v2 = vsel %vm1174_vm7, %v1166_v58, %v1200_v36  ;;  %v1167_v38 = vperm.slane %v1093_v57, %v1867_v31 }
 0x278   : > { %v1202_v34 = vsel %vm1176_vm8, %v1167_v38, %v1201_v2 }
 0x279   : > { %v1105_v43 = vpop.xlane.xlu1 %1104  ;;  %v1203_v44 = vsel %vm1178_vm9, %v1168_v41, %v1202_v34 }
 0x27a   : > { %v1171_v20 = vperm.slane %v1105_v43, %v1867_v31 }
 0x27b   : > { %v1099_v39 = vpop.xlane.xlu0 %1098 }
 0x27c   : > { %v1169_v40 = vperm.slane %v1099_v39, %v1867_v31 }
 0x27d   : > { %v1102_v46 = vpop.xlane.xlu2 %1101 }
 0x27e   : > { %v1204_v9 = vsel %vm1180_vm10, %v1169_v40, %v1203_v44  ;;  %v1170_v48 = vperm.slane %v1102_v46, %v1867_v31 }
 0x280   : > { %v1205_v17 = vsel %vm1182_vm11, %v1170_v48, %v1204_v9 }
 0x281   : > { %v1206_v25 = vsel %vm1184_vm12, %v1171_v20, %v1205_v17 }
 0x282   : > { %1214 = vst.msk [vmem:[%s1884_s11 + $0x18] sm:$0xff] %vm1009_vm5, %v1206_v25 }
 0x283   : > { %v1081_v50 = vpop.xlane.xlu0 %1080 }
 0x284   : > { %v1163_v53 = vperm.slane %v1081_v50, %v1867_v31 }
 0x286   : > { %v1199_v54 = vsel %vm1184_vm12, %v1163_v53, %v1198_v49 }
 0x287   : > { %1213 = vst.msk [vmem:[%s1884_s11 + $0x10] sm:$0xff] %vm1009_vm5, %v1199_v54 }
 0x288 PF: > { %s17_s26 = sadd.s32 1, %s1385_s26   ;;  %s1960_s24 = smov %s1381_s25 }
 0x289   : > { %p14_p5 = scmp.ge.s32.totalorder %s17_s26, 4   ;;  %s1961_s25 = smov %s1963_s27 }
 0x28b   :  { %16 = sbr.rel (!%p14_p5) target bundleno = 2 (0x2), region = 78 }

// kernel: pointnet_sa_msg_forward.3
= control target key start
LH: loop header
LB: loop body
LE: loop exit
PB: predicated region body
PF: predicated region fallthrough
CT: control target
= control target key end

     0   :  { %s1438_s24 = smov 0   ;;  %s1440_s25 = smov 0   ;;  %s1954_s0 = inlined_call_operand.vmem [shape: bf16[2,7,128], index: 0, kind: input, shape index: {}]   ;;  %s1955_s1 = inlined_call_operand.vmem [shape: bf16[16,7], index: 1, kind: input, shape index: {}]   ;;  %s1956_s2 = inlined_call_operand.vmem [shape: f32[16,1], index: 2, kind: input, shape index: {}]   ;;  %s1957_s3 = inlined_call_operand.vmem [shape: f32[16,1], index: 3, kind: input, shape index: {}]   ;;  %s1958_s4 = inlined_call_operand.vmem [shape: bf16[32,16], index: 4, kind: input, shape index: {}]   ;;  %s1959_s5 = inlined_call_operand.vmem [shape: f32[32,1], index: 5, kind: input, shape index: {}]   ;;  %s1960_s6 = inlined_call_operand.vmem [shape: f32[32,1], index: 6, kind: input, shape index: {}]   ;;  %s1961_s7 = inlined_call_operand.vmem [shape: f32[2,32,8], index: 7, kind: output, shape index: {}]  }
   0x1   :  { %s1442_s26 = smov 0  }
   0x2 LB: > { %s29_s27 = sadd.s32 1, %s1381_s25  ;;  %p1299_p0 = scmp.ge.s32.totalorder %s1385_s26, 1  ;;  %s1385_s26 = sphi %s1442_s26, %s17_s26   ;;  %s1381_s25 = sphi %s1440_s25, %s1963_s25   ;;  %s1377_s24 = sphi %s1438_s24, %s1962_s24  }
   0x3   : > { %p31_p1 = scmp.ge.s32.totalorder %s29_s27, 2  ;;  %p255_p2 = scmp.lt.s32.totalorder %s1385_s26, 3 }
   0x5   : > { %s1965_s27 = smov (%p31_p1, %s29_s27), 0  ;;  %p256_p3 = pnand %p1299_p0, %p255_p2 }
   0x6   : > { %p292_p4 = scmp.lt.s32.totalorder (!%p256_p3), %s1377_s24, 1  ;;  %s1389_s20 = smov (!%p256_p3), 80  }
   0x7   : > { %259 = sbr.rel (%p256_p3) target bundleno = 648 (0x288), region = 48  ;;  %s1390_s21 = smov (!%p256_p3), 96  }
   0x8   : > { %s1391_s22 = smov (!%p256_p3), 112   ;;  %s1392_s23 = smov (!%p256_p3), 32  }
   0x9   : > { %s1393_s28 = smov (!%p256_p3), 48   ;;  %s1394_s29 = smov (!%p256_p3), 64  }
   0xa   : > { %s1395_s30 = smov (!%p256_p3), 16  }
   0xc   : > { %v313_v0 = vld [vmem:[%s1957_s3] sm:$0xff]  ;;  %vm324_vm0 = vcmask 1042432   ;;  %v1387_v2 = vmov 0   ;;  %vm325_vm1 = vcmask 1043456   ;;  %s1967_s24 = smov (!%p292_p4, %s1377_s24), 1  ;;  %v1388_v3 = vmov 65535  }
   0xd   : > { %v311_v1 = vld [vmem:[%s1956_s2] sm:$0xff]  ;;  %1361 = vset.pattern.permute.xlu1 %v1387_v2  ;;  %1360 = vset.pattern.permute.xlu0 %v1387_v2  ;;  %v326_v4 = vsel %vm324_vm0, 4294967295, %v1388_v3  ;;  %s1300_s9 = sshll.u32 %s1967_s24, 2  ;;  %v314_v8 = vld [vmem:[%s1957_s3 + $0x8] sm:$0xff]  ;;  %vm320_vm2 = vcmask 56320   ;;  %v379_v11 = vld [vmem:[%s1959_s5 + $0x18] sm:$0xff] }
   0xe   : > { %359 = vperm.xlu1 %1361, %v313_v0   ;;  %347 = vperm.xlu0 %1360, %v311_v1   ;;  %v327_v5 = vsel %vm325_vm1, %v326_v4, 0  ;;  %s298_s12 = scalar_lea.vmem %s1954_s0, %s1300_s9  ;;  %v312_v9 = vld [vmem:[%s1956_s2 + $0x8] sm:$0xff]  ;;  %v1321_v10 = vld [vmem:[%s1955_s1] sm:$0xff]  ;;  %v378_v12 = vld [vmem:[%s1959_s5 + $0x10] sm:$0xff]  ;;  %vm394_vm3 = vcmask 130048   ;;  %vm561_vm4 = vcmask 1047556  }
   0xf   : > { %1362 = vset.pattern.permute.xlu2 %v1387_v2  ;;  %v308_v6 = vld [vmem:[%s298_s12] sm:$0xf]  ;;  %v382_v13 = vld [vmem:[%s1960_s6 + $0x10] sm:$0xff]  ;;  %v381_v14 = vld [vmem:[%s1960_s6 + $0x8] sm:$0xff]  ;;  %v1396_v60 = vmov 1983009808  }
  0x10   : > { %v329_v7 = vand.u32 %v327_v5, %v308_v6  ;;  %v376_v15 = vld [vmem:[%s1959_s5] sm:$0xff]  ;;  %v377_v16 = vld [vmem:[%s1959_s5 + $0x8] sm:$0xff]  ;;  %v383_v21 = vld [vmem:[%s1960_s6 + $0x18] sm:$0xff]  ;;  %v566_v61 = vunpack.c.l.s4 %v1396_v60  ;;  %vm1171_vm5 = vcmask 1041409   ;;  %vm1173_vm6 = vcmask 1042434   ;;  %s1320_s8 = sshll.u32 %s1967_s24, 5 }
  0x11   : > { %422 = vperm.xlu2 %1362, %v376_v15   ;;  %v380_v17 = vld [vmem:[%s1960_s6] sm:$0xff]  ;;  %v1323_v33 = vld [vmem:[%s1958_s4 + $0x8] sm:$0xff]  ;;  %vm1175_vm7 = vcmask 1043459   ;;  %vm1177_vm8 = vcmask 1044484   ;;  %vm1179_vm9 = vcmask 1045509   ;;  %vm1181_vm10 = vcmask 1046534   ;;  %s1886_s11 = scalar_lea.vmem %s1961_s7, %s1320_s8 }
  0x12   : > { %338 = vmatpush.bf16.msra.mxu0 %v329_v7  ;;  %v1322_v32 = vld [vmem:[%s1958_s4] sm:$0xff]  ;;  %v1574_v1 = vunpack.c.0.s8 %v566_v61  ;;  %vm1183_vm11 = vcmask 1047559   ;;  %vm1210_vm12 = vcmask 64512  }
  0x15   : > { %1307 = vmatmul.msk.bf16.vlgmr.msra.gmra.mxu0 %vm320_vm2, %v1321_v10 }
  0x16   : > { %364 = vperm.xlu1 %1361, %v314_v8   ;;  %352 = vperm.xlu0 %1360, %v312_v9  }
  0x19   : > { %427 = vperm.xlu2 %1362, %v377_v16  }
  0x1e   : > { %437 = vperm.xlu1 %1361, %v379_v11   ;;  %432 = vperm.xlu0 %1360, %v378_v12   ;;  %v1397_v12 = vmov 1934713408  }
  0x21   : > { %446 = vperm.xlu2 %1362, %v380_v17  }
  0x26   : > { %456 = vperm.xlu1 %1361, %v382_v13   ;;  %451 = vperm.xlu0 %1360, %v381_v14   ;;  %v614_v13 = vunpack.c.l.s4 %v1397_v12 }
  0x29   : > { %461 = vperm.xlu2 %1362, %v383_v21  }
  0x6b   : > { %v423_v34 = vpop.permute.xlu2 %422 }
  0x73   : > { %v428_v35 = vpop.permute.xlu2 %427 }
  0x7b   : > { %v447_v38 = vpop.permute.xlu2 %446 }
  0x80   : > { %v348_v18 = vpop.permute.xlu0 %347  ;;  %v360_v19 = vpop.permute.xlu1 %359 }
  0x83   : > { %v462_v55 = vpop.permute.xlu2 %461 }
  0x88   : > { %v353_v23 = vpop.permute.xlu0 %352  ;;  %v365_v27 = vpop.permute.xlu1 %364 }
  0x90   : > { %v438_v41 = vpop.permute.xlu1 %437  ;;  %v433_v43 = vpop.permute.xlu0 %432 }
  0x92   : > { %v340_v20 = vpop.f32.mrf.mxu0 }
  0x93   : > { %v355_v22 = vmul.f32 %v348_v18, %v340_v20 }
  0x95   : > { %v367_v25 = vadd.f32 %v360_v19, %v355_v22 }
  0x97   : > { %v369_v29 = vmax.f32 %v367_v25, 0.0 }
  0x98   : > { %v457_v45 = vpop.permute.xlu1 %456  ;;  %v452_v50 = vpop.permute.xlu0 %451 }
  0x9a   : > { %v342_v24 = vpop.f32.mrf.mxu0 }
  0x9b   : > { %v356_v26 = vmul.f32 %v353_v23, %v342_v24  ;;  %v1595_v23 = vunpack.c.0.s8 %v614_v13 }
  0x9d   : > { %v368_v28 = vadd.f32 %v365_v27, %v356_v26 }
  0x9f   : > { %v370_v30 = vmax.f32 %v368_v28, 0.0 }
  0xa1   : > { %v371_v31 = vpack.c.bf16 %v370_v30, %v369_v29 }
  0xa3   : > { %408 = vmatpush.bf16.msra.mxu1 %v371_v31  ;;  %1324 = vmatpush.bf16.msra.mxu2 %v371_v31 }
  0xa6   : > { %1316 = vmatmul.msk.bf16.vlgmr.msra.gmra.mxu1 %vm394_vm3, %v1322_v32  ;;  %1317 = vmatmul.msk.bf16.vlgmr.msra.gmra.mxu2 %vm394_vm3, %v1323_v33 }
 0x123   : > { %v410_v36 = vpop.f32.mrf.mxu1 }
 0x124   : > { %v440_v37 = vmul.f32 %v423_v34, %v410_v36 }
 0x126   : > { %v464_v39 = vadd.f32 %v447_v38, %v440_v37 }
 0x128   : > { %v1509_v40 = vmax.f32 %v464_v39, 0.0 }
 0x129   : > { %v415_v42 = vpop.f32.mrf.mxu2 }
 0x12a   : > { %500 = vrot.lane.b32.xlu2 %v1509_v40, %s1389_s20  ;;  %488 = vrot.lane.b32.xlu1 %v1509_v40, %s1390_s21  ;;  %v442_v44 = vmul.f32 %v433_v43, %v415_v42  ;;  %v563_v0 = vrot.slane %v1509_v40, 4 }
 0x12b   : > { %476 = vrot.lane.b32.xlu0 %v1509_v40, %s1391_s22  ;;  %v412_v48 = vpop.f32.mrf.mxu1 }
 0x12c   : > { %v466_v46 = vadd.f32 %v457_v45, %v442_v44  ;;  %v441_v49 = vmul.f32 %v428_v35, %v412_v48 }
 0x12e   : > { %v1523_v47 = vmax.f32 %v466_v46, 0.0  ;;  %v465_v51 = vadd.f32 %v452_v50, %v441_v49 }
 0x130   : > { %v1537_v52 = vmax.f32 %v465_v51, 0.0 }
 0x131   : > { %v417_v53 = vpop.f32.mrf.mxu2 }
 0x132   : > { %536 = vrot.lane.b32.xlu2 %v1509_v40, %s1392_s23  ;;  %524 = vrot.lane.b32.xlu1 %v1509_v40, %s1393_s28  ;;  %v443_v54 = vmul.f32 %v438_v41, %v417_v53 }
 0x133   : > { %512 = vrot.lane.b32.xlu0 %v1509_v40, %s1394_s29 }
 0x134   : > { %v467_v56 = vadd.f32 %v462_v55, %v443_v54 }
 0x136   : > { %v1557_v57 = vmax.f32 %v467_v56, 0.0 }
 0x13a   : > { %480 = vrot.lane.b32.xlu2 %v1523_v47, %s1391_s22  ;;  %504 = vrot.lane.b32.xlu1 %v1523_v47, %s1389_s20 }
 0x13b   : > { %548 = vrot.lane.b32.xlu0 %v1509_v40, %s1395_s30 }
 0x142   : > { %516 = vrot.lane.b32.xlu2 %v1523_v47, %s1394_s29  ;;  %540 = vrot.lane.b32.xlu1 %v1523_v47, %s1392_s23 }
 0x143   : > { %492 = vrot.lane.b32.xlu0 %v1523_v47, %s1390_s21 }
 0x14a   : > { %552 = vrot.lane.b32.xlu2 %v1523_v47, %s1395_s30  ;;  %478 = vrot.lane.b32.xlu1 %v1537_v52, %s1391_s22 }
 0x14b   : > { %528 = vrot.lane.b32.xlu0 %v1523_v47, %s1393_s28 }
 0x152   : > { %490 = vrot.lane.b32.xlu2 %v1537_v52, %s1390_s21  ;;  %514 = vrot.lane.b32.xlu1 %v1537_v52, %s1394_s29 }
 0x153   : > { %502 = vrot.lane.b32.xlu0 %v1537_v52, %s1389_s20 }
 0x15a   : > { %526 = vrot.lane.b32.xlu2 %v1537_v52, %s1393_s28  ;;  %550 = vrot.lane.b32.xlu1 %v1537_v52, %s1395_s30 }
 0x15b   : > { %538 = vrot.lane.b32.xlu0 %v1537_v52, %s1392_s23 }
 0x162   : > { %506 = vrot.lane.b32.xlu2 %v1557_v57, %s1389_s20  ;;  %494 = vrot.lane.b32.xlu1 %v1557_v57, %s1390_s21 }
 0x163   : > { %482 = vrot.lane.b32.xlu0 %v1557_v57, %s1391_s22 }
 0x16a   : > { %542 = vrot.lane.b32.xlu2 %v1557_v57, %s1392_s23  ;;  %530 = vrot.lane.b32.xlu1 %v1557_v57, %s1393_s28 }
 0x16b   : > { %518 = vrot.lane.b32.xlu0 %v1557_v57, %s1394_s29 }
 0x173   : > { %554 = vrot.lane.b32.xlu0 %v1557_v57, %s1395_s30 }
 0x184   : > { %v501_v58 = vpop.permute.xlu2 %500 }
 0x185   : > { %v573_v9 = vrot.slane %v501_v58, 4 }
 0x18c   : > { %v537_v59 = vpop.permute.xlu2 %536 }
 0x18d   : > { %v585_v17 = vrot.slane %v537_v59, 4 }
 0x194   : > { %v1576_v2 = vpop.permute.xlu2 %480 }
 0x19c   : > { %v489_v62 = vpop.permute.xlu1 %488  ;;  %v1591_v20 = vpop.permute.xlu2 %516 }
 0x19d   : > { %v477_v63 = vpop.permute.xlu0 %476  ;;  %v564_v3 = vsel %vm561_vm4, %v489_v62, %v563_v0  ;;  %v560_v6 = vrot.slane %v489_v62, 4 }
 0x19e   : > { %v575_v4 = vrot.slane %v477_v63, 4  ;;  %v1580_v5 = vperm.slane %v564_v3, %v1574_v1  ;;  %v574_v15 = vsel %vm561_vm4, %v573_v9, %v477_v63 }
 0x19f   : > { %v562_v18 = vsel %vm561_vm4, %v560_v6, %v1509_v40  ;;  %v580_v21 = vperm.slane %v574_v15, %v1574_v1 }
 0x1a0   : > { %v576_v7 = vsel %vm561_vm4, %v501_v58, %v575_v4  ;;  %v623_v14 = vrot.slane %v1580_v5, 4  ;;  %v568_v24 = vperm.slane %v562_v18, %v1574_v1 }
 0x1a1   : > { %v1586_v16 = vperm.slane %v576_v7, %v1574_v1  ;;  %v609_v31 = vrot.slane %v580_v21, 4 }
 0x1a2   : > { %v611_v35 = vrot.slane %v568_v24, 4 }
 0x1a3   : > { %v624_v26 = vsel %vm561_vm4, %v1586_v16, %v623_v14  ;;  %v610_v44 = vsel %vm561_vm4, %v609_v31, %v568_v24  ;;  %v621_v62 = vrot.slane %v1586_v16, 4 }
 0x1a4   : > { %v525_v8 = vpop.permute.xlu1 %524  ;;  %v632_v34 = vperm.slane %v624_v26, %v1595_v23  ;;  %v612_v46 = vsel %vm561_vm4, %v580_v21, %v611_v35  ;;  %v1614_v49 = vpop.permute.xlu2 %552  ;;  %v616_v58 = vperm.slane %v610_v44, %v1595_v23  ;;  %v675_v35 = vrot.slane %v1537_v52, 4 }
 0x1a5   : > { %v513_v10 = vpop.permute.xlu0 %512  ;;  %v599_v27 = vrot.slane %v525_v8, 4  ;;  %v821_v14 = vrot.slane %v1614_v49, 4 }
 0x1a6   : > { %v587_v11 = vrot.slane %v513_v10, 4  ;;  %v586_v22 = vsel %vm561_vm4, %v585_v17, %v513_v10  ;;  %v671_v43 = vrot.slane %v632_v34, 4 }
 0x1a7   : > { %v592_v29 = vperm.slane %v586_v22, %v1574_v1  ;;  %v622_v22 = vsel %vm561_vm4, %v621_v62, %v1580_v5  ;;  %v811_v5 = vrot.slane %v1591_v20, 4 }
 0x1a8   : > { %v588_v19 = vsel %vm561_vm4, %v537_v59, %v587_v11  ;;  %v620_v59 = vperm.slane %v612_v46, %v1595_v23 }
 0x1a9   : > { %v596_v25 = vperm.slane %v588_v19, %v1574_v1  ;;  %v635_v39 = vrot.slane %v592_v29, 4 }
 0x1ab   : > { %v647_v36 = vrot.slane %v596_v25, 4 }
 0x1ac   : > { %v1601_v28 = vpop.permute.xlu1 %504  ;;  %v1644_v24 = vpop.permute.xlu2 %490 }
 0x1ad   : > { %v549_v30 = vpop.permute.xlu0 %548  ;;  %v797_v63 = vrot.slane %v1601_v28, 4 }
 0x1ae   : > { %v597_v32 = vrot.slane %v549_v30, 4  ;;  %v600_v33 = vsel %vm561_vm4, %v549_v30, %v599_v27 }
 0x1af   : > { %v608_v37 = vperm.slane %v600_v33, %v1574_v1  ;;  %v798_v15 = vsel %vm561_vm4, %v797_v63, %v1576_v2 }
 0x1b0   : > { %v598_v38 = vsel %vm561_vm4, %v597_v32, %v525_v8  ;;  %v659_v8 = vrot.slane %v616_v58, 4  ;;  %v804_v30 = vperm.slane %v798_v15, %v1574_v1  ;;  %v663_v32 = vrot.slane %v620_v59, 4 }
 0x1b1   : > { %v604_v40 = vperm.slane %v598_v38, %v1574_v1  ;;  %v648_v41 = vsel %vm561_vm4, %v608_v37, %v647_v36  ;;  %v645_v50 = vrot.slane %v608_v37, 4  ;;  %v628_v37 = vperm.slane %v622_v22, %v1595_v23 }
 0x1b2   : > { %v656_v42 = vperm.slane %v648_v41, %v1595_v23  ;;  %v676_v41 = vsel %vm561_vm4, %v1644_v24, %v675_v35 }
 0x1b3   : > { %v633_v45 = vrot.slane %v604_v40, 4  ;;  %v636_v48 = vsel %vm561_vm4, %v604_v40, %v635_v39  ;;  %v646_v3 = vsel %vm561_vm4, %v645_v50, %v596_v25 }
 0x1b4   : > { %v541_v51 = vpop.permute.xlu1 %540  ;;  %v672_v53 = vsel %vm561_vm4, %v656_v42, %v671_v43  ;;  %v644_v54 = vperm.slane %v636_v48, %v1595_v23  ;;  %v669_v10 = vrot.slane %v656_v42, 4  ;;  %v652_v13 = vperm.slane %v646_v3, %v1595_v23 }
 0x1b5   : > { %v1618_v55 = vpop.permute.xlu0 %492  ;;  %v1030_v56 = vsel %vm394_vm3, %v672_v53, -inf  ;;  %v634_v61 = vsel %vm561_vm4, %v633_v45, %v592_v29  ;;  %v809_v9 = vrot.slane %v541_v51, 4  ;;  %v833_v43 = vrot.slane %v804_v30, 4 }
 0x1b6   : > { %1031 = vmax.xlane.f32.xlu1 %v1030_v56  ;;  %v661_v60 = vrot.slane %v644_v54, 4  ;;  %v785_v4 = vrot.slane %v1618_v55, 4  ;;  %v640_v7 = vperm.slane %v634_v61, %v1595_v23  ;;  %v670_v29 = vsel %vm561_vm4, %v669_v10, %v632_v34 }
 0x1b7   : > { %v810_v25 = vsel %vm561_vm4, %v809_v9, %v1591_v20  ;;  %v665_v33 = vrot.slane %v652_v13, 4  ;;  %v1027_v34 = vsel %vm394_vm3, %v670_v29, -inf  ;;  %v664_v40 = vsel %vm561_vm4, %v644_v54, %v663_v32 }
 0x1b8   : > { %v662_v0 = vsel %vm561_vm4, %v661_v60, %v620_v59  ;;  %v660_v11 = vsel %vm561_vm4, %v640_v7, %v659_v8  ;;  %v657_v12 = vrot.slane %v640_v7, 4  ;;  %v786_v18 = vsel %vm561_vm4, %v785_v4, %v1523_v47  ;;  %v527_v7 = vpop.permute.xlu2 %526 }
 0x1b9   : > { %v1015_v6 = vsel %vm394_vm3, %v662_v0, -inf  ;;  %v1012_v16 = vsel %vm394_vm3, %v660_v11, -inf  ;;  %v792_v36 = vperm.slane %v786_v18, %v1574_v1  ;;  %v816_v38 = vperm.slane %v810_v25, %v1574_v1 }
 0x1ba   : > { %1016 = vmax.xlane.f32.xlu0 %v1015_v6  ;;  %1013 = vmax.xlane.f32.xlu2 %v1012_v16  ;;  %v658_v21 = vsel %vm561_vm4, %v657_v12, %v616_v58  ;;  %v812_v20 = vsel %vm561_vm4, %v541_v51, %v811_v5  ;;  %v666_v44 = vsel %vm561_vm4, %v665_v33, %v628_v37  ;;  %v1018_v50 = vsel %vm394_vm3, %v664_v40, -inf }
 0x1bb   : > { %v1009_v27 = vsel %vm394_vm3, %v658_v21, -inf  ;;  %v835_v46 = vrot.slane %v792_v36, 4  ;;  %v1669_v56 = vperm.slane %v676_v41, %v1574_v1  ;;  %v787_v58 = vrot.slane %v1523_v47, 4 }
 0x1bc   : > { %v1637_v17 = vpop.permute.xlu1 %478  ;;  %v834_v51 = vsel %vm561_vm4, %v833_v43, %v792_v36  ;;  %v1021_v62 = vsel %vm394_vm3, %v666_v44, -inf  ;;  %v799_v0 = vrot.slane %v1576_v2, 4  ;;  %v820_v3 = vperm.slane %v812_v20, %v1574_v1 }
 0x1bd   : > { %v529_v19 = vpop.permute.xlu0 %528  ;;  %v687_v48 = vrot.slane %v1637_v17, 4  ;;  %v667_v4 = vrot.slane %v628_v37, 4  ;;  %v859_v6 = vrot.slane %v816_v38, 4  ;;  %v788_v47 = vsel %vm561_vm4, %v1618_v55, %v787_v58 }
 0x1be   : > { %v822_v26 = vsel %vm561_vm4, %v821_v14, %v529_v19  ;;  %1010 = vmax.xlane.f32.xlu1 %v1009_v27  ;;  %v823_v42 = vrot.slane %v529_v19, 4  ;;  %v840_v8 = vperm.slane %v834_v51, %v1595_v23  ;;  %v800_v9 = vsel %vm561_vm4, %v1601_v28, %v799_v0 }
 0x1bf   : > { %v828_v31 = vperm.slane %v822_v26, %v1574_v1  ;;  %v668_v11 = vsel %vm561_vm4, %v652_v13, %v667_v4  ;;  %v673_v12 = vrot.slane %v1644_v24, 4  ;;  %v735_v14 = vrot.slane %v1669_v56, 4 }
 0x1c0   : > { %v824_v60 = vsel %vm561_vm4, %v1614_v49, %v823_v42  ;;  %v836_v49 = vsel %vm561_vm4, %v804_v30, %v835_v46  ;;  %v871_v16 = vrot.slane %v820_v3, 4  ;;  %v796_v18 = vperm.slane %v788_v47, %v1574_v1 }
 0x1c1   : > { %v857_v39 = vrot.slane %v828_v31, 4  ;;  %v832_v10 = vperm.slane %v824_v60, %v1574_v1  ;;  %v860_v15 = vsel %vm561_vm4, %v828_v31, %v859_v6  ;;  %v711_v19 = vrot.slane %v527_v7, 4  ;;  %v1740_v6 = vpop.permute.xlu2 %506 }
 0x1c2   : > { %1028 = vmax.xlane.f32.xlu0 %v1027_v34  ;;  %1019 = vmax.xlane.f32.xlu2 %v1018_v50  ;;  %v844_v28 = vperm.slane %v836_v49, %v1595_v23  ;;  %v1024_v25 = vsel %vm394_vm3, %v668_v11, -inf  ;;  %v883_v13 = vrot.slane %v840_v8, 4  ;;  %v868_v31 = vperm.slane %v860_v15, %v1595_v23 }
 0x1c3   : > { %v858_v45 = vsel %vm561_vm4, %v857_v39, %v816_v38  ;;  %v869_v27 = vrot.slane %v832_v10, 4  ;;  %v808_v36 = vperm.slane %v800_v9, %v1574_v1  ;;  %v872_v39 = vsel %vm561_vm4, %v832_v10, %v871_v16 }
 0x1c4   : > { %v515_v53 = vpop.permute.xlu1 %514  ;;  %v864_v54 = vperm.slane %v858_v45, %v1595_v23  ;;  %v887_v38 = vrot.slane %v844_v28, 4  ;;  %v847_v46 = vrot.slane %v796_v18, 4  ;;  %v1728_v58 = vperm.slane %v872_v39, %v1595_v23 }
 0x1c5   : > { %v503_v59 = vpop.permute.xlu0 %502  ;;  %v699_v22 = vrot.slane %v515_v53, 4  ;;  %v870_v45 = vsel %vm561_vm4, %v869_v27, %v820_v3  ;;  %v885_v4 = vrot.slane %v868_v31, 4 }
 0x1c6   : > { %v688_v61 = vsel %vm561_vm4, %v503_v59, %v687_v48  ;;  %v881_v63 = vrot.slane %v864_v54, 4  ;;  %1022 = vmax.xlane.f32.xlu1 %v1021_v62  ;;  %v685_v21 = vrot.slane %v503_v59, 4  ;;  %v884_v41 = vsel %vm561_vm4, %v864_v54, %v883_v13 }
 0x1c7   : > { %v1687_v2 = vperm.slane %v688_v61, %v1574_v1  ;;  %v876_v61 = vperm.slane %v870_v45, %v1595_v23  ;;  %v845_v62 = vrot.slane %v808_v36, 4  ;;  %v893_v10 = vrot.slane %v1728_v58, 4 }
 0x1c8   : > { %v882_v55 = vsel %vm561_vm4, %v881_v63, %v840_v8  ;;  %v686_v34 = vsel %vm561_vm4, %v685_v21, %v1637_v17  ;;  %v888_v17 = vsel %vm561_vm4, %v868_v31, %v887_v38  ;;  %v674_v63 = vsel %vm561_vm4, %v673_v12, %v1537_v52 }
 0x1c9   : > { %v736_v24 = vsel %vm561_vm4, %v1687_v2, %v735_v14  ;;  %v1057_v30 = vsel %vm394_vm3, %v882_v55, -inf  ;;  %v692_v50 = vperm.slane %v686_v34, %v1574_v1  ;;  %v1066_v47 = vsel %vm394_vm3, %v888_v17, -inf  ;;  %v543_v34 = vpop.permute.xlu2 %542 }
 0x1ca   : > { %1025 = vmax.xlane.f32.xlu2 %v1024_v25  ;;  %v1713_v42 = vperm.slane %v736_v24, %v1595_v23  ;;  %v848_v8 = vsel %vm561_vm4, %v808_v36, %v847_v46  ;;  %v846_v11 = vsel %vm561_vm4, %v845_v62, %v796_v18  ;;  %v680_v12 = vperm.slane %v674_v63, %v1574_v1 }
 0x1cb   : > { %v721_v49 = vrot.slane %v692_v50, 4  ;;  %v889_v14 = vrot.slane %v876_v61, 4  ;;  %v886_v16 = vsel %vm561_vm4, %v885_v4, %v844_v28  ;;  %v852_v21 = vperm.slane %v846_v11, %v1595_v23 }
 0x1cc   : > { %v551_v26 = vpop.permute.xlu1 %550  ;;  %v783_v60 = vrot.slane %v1713_v42, 4  ;;  %v1063_v13 = vsel %vm394_vm3, %v886_v16, -inf  ;;  %v909_v28 = vrot.slane %v1740_v6, 4  ;;  %v733_v24 = vrot.slane %v1687_v2, 4 }
 0x1cd   : > { %v539_v29 = vpop.permute.xlu0 %538  ;;  %v709_v5 = vrot.slane %v551_v26, 4  ;;  %v712_v35 = vsel %vm561_vm4, %v551_v26, %v711_v19  ;;  %v1755_v19 = vperm.slane %v848_v8, %v1595_v23  ;;  %v722_v18 = vsel %vm561_vm4, %v721_v49, %v680_v12 }
 0x1ce   : > { %v697_v32 = vrot.slane %v539_v29, 4  ;;  %v700_v33 = vsel %vm561_vm4, %v539_v29, %v699_v22  ;;  %1058 = vmax.xlane.f32.xlu1 %v1057_v30  ;;  %v1718_v44 = vperm.slane %v712_v35, %v1574_v1  ;;  %v723_v26 = vrot.slane %v680_v12, 4 }
 0x1cf   : > { %v1705_v37 = vperm.slane %v700_v33, %v1574_v1  ;;  %v710_v48 = vsel %vm561_vm4, %v709_v5, %v527_v7  ;;  %v894_v22 = vsel %vm561_vm4, %v893_v10, %v1755_v19  ;;  %v890_v27 = vsel %vm561_vm4, %v889_v14, %v852_v21 }
 0x1d0   : > { %v698_v40 = vsel %vm561_vm4, %v697_v32, %v515_v53  ;;  %v1060_v53 = vsel %vm394_vm3, %v884_v41, -inf  ;;  %v716_v0 = vperm.slane %v710_v48, %v1574_v1  ;;  %v757_v29 = vrot.slane %v1718_v44, 4 }
 0x1d1   : > { %v704_v43 = vperm.slane %v698_v40, %v1574_v1  ;;  %v759_v20 = vrot.slane %v1705_v37, 4  ;;  %v1075_v33 = vsel %vm394_vm3, %v894_v22, -inf  ;;  %v724_v5 = vsel %vm561_vm4, %v692_v50, %v723_v26 }
 0x1d2   : > { %1061 = vmax.xlane.f32.xlu2 %v1060_v53  ;;  %v745_v15 = vrot.slane %v716_v0, 4  ;;  %v728_v35 = vperm.slane %v722_v18, %v1595_v23  ;;  %v1069_v2 = vsel %vm394_vm3, %v890_v27, -inf  ;;  %v891_v38 = vrot.slane %v852_v21, 4 }
 0x1d3   : > { %v760_v54 = vsel %vm561_vm4, %v1718_v44, %v759_v20  ;;  %v747_v59 = vrot.slane %v704_v43, 4  ;;  %v732_v20 = vperm.slane %v724_v5, %v1595_v23  ;;  %v758_v44 = vsel %vm561_vm4, %v757_v29, %v1705_v37 }
 0x1d4   : > { %v1731_v51 = vperm.slane %v760_v54, %v1595_v23  ;;  %v1746_v9 = vpop.permute.xlu1 %494  ;;  %v746_v31 = vsel %vm561_vm4, %v745_v15, %v704_v43  ;;  %v892_v43 = vsel %vm561_vm4, %v876_v61, %v891_v38  ;;  %v771_v48 = vrot.slane %v728_v35, 4 }
 0x1d5   : > { %v1738_v3 = vpop.permute.xlu0 %482  ;;  %v748_v55 = vsel %vm561_vm4, %v716_v0, %v747_v59  ;;  %v897_v32 = vrot.slane %v1746_v9, 4  ;;  %v752_v40 = vperm.slane %v746_v31, %v1595_v23  ;;  %v734_v17 = vsel %vm561_vm4, %v733_v24, %v1669_v56 }
 0x1d6   : > { %v784_v7 = vsel %vm561_vm4, %v1731_v51, %v783_v60  ;;  %1067 = vmax.xlane.f32.xlu1 %v1066_v47  ;;  %v1761_v25 = vperm.slane %v748_v55, %v1595_v23  ;;  %v910_v36 = vsel %vm561_vm4, %v909_v28, %v1738_v3  ;;  %v921_v50 = vrot.slane %v543_v34, 4 }
 0x1d7   : > { %v1054_v52 = vsel %vm394_vm3, %v784_v7, -inf  ;;  %v1784_v45 = vperm.slane %v910_v36, %v1574_v1  ;;  %v898_v46 = vsel %vm561_vm4, %v897_v32, %v1557_v57  ;;  %v1072_v59 = vsel %vm394_vm3, %v892_v43, -inf }
 0x1d8   : > { %1055 = vmax.xlane.f32.xlu0 %v1054_v52  ;;  %v773_v39 = vrot.slane %v1761_v25, 4  ;;  %v772_v60 = vsel %vm561_vm4, %v752_v40, %v771_v48  ;;  %v764_v37 = vperm.slane %v758_v44, %v1595_v23  ;;  %v911_v61 = vrot.slane %v1738_v3, 4 }
 0x1d9   : > { %v1796_v62 = vperm.slane %v898_v46, %v1574_v1  ;;  %v769_v0 = vrot.slane %v752_v40, 4  ;;  %v740_v56 = vperm.slane %v734_v17, %v1595_v23  ;;  %v945_v4 = vrot.slane %v1784_v45, 4 }
 0x1da   : > { %1064 = vmax.xlane.f32.xlu2 %v1063_v13  ;;  %v774_v53 = vsel %vm561_vm4, %v773_v39, %v732_v20  ;;  %v1036_v52 = vsel %vm394_vm3, %v772_v60, -inf  ;;  %v777_v12 = vrot.slane %v764_v37, 4  ;;  %v912_v16 = vsel %vm561_vm4, %v1740_v6, %v911_v61 }
 0x1db   : > { %v1039_v8 = vsel %vm394_vm3, %v774_v53, -inf  ;;  %v770_v55 = vsel %vm561_vm4, %v769_v0, %v728_v35  ;;  %v779_v15 = vrot.slane %v740_v56, 4  ;;  %v946_v21 = vsel %vm561_vm4, %v945_v4, %v1796_v62 }
 0x1dc   : > { %v531_v41 = vpop.permute.xlu1 %530  ;;  %v1033_v28 = vsel %vm394_vm3, %v770_v55, -inf  ;;  %v778_v24 = vsel %vm561_vm4, %v777_v12, %v740_v56  ;;  %v899_v29 = vrot.slane %v1557_v57, 4  ;;  %v952_v6 = vperm.slane %v946_v21, %v1595_v23 }
 0x1dd   : > { %v519_v30 = vpop.permute.xlu0 %518  ;;  %v935_v54 = vrot.slane %v531_v41, 4  ;;  %v780_v13 = vsel %vm561_vm4, %v764_v37, %v779_v15  ;;  %v920_v31 = vperm.slane %v912_v16, %v1574_v1  ;;  %v1045_v57 = vsel %vm394_vm3, %v778_v24, -inf }
 0x1de   : > { %1076 = vmax.xlane.f32.xlu1 %v1075_v33  ;;  %v923_v49 = vrot.slane %v519_v30, 4  ;;  %v922_v3 = vsel %vm561_vm4, %v921_v50, %v519_v30  ;;  %v1048_v33 = vsel %vm394_vm3, %v780_v13, -inf  ;;  %v900_v35 = vsel %vm561_vm4, %v1746_v9, %v899_v29 }
 0x1df   : > { %v928_v18 = vperm.slane %v922_v3, %v1574_v1  ;;  %v995_v40 = vrot.slane %v952_v6, 4  ;;  %v957_v43 = vrot.slane %v920_v31, 4  ;;  %v908_v44 = vperm.slane %v900_v35, %v1574_v1 }
 0x1e0   : > { %1070 = vmax.xlane.f32.xlu0 %v1069_v2  ;;  %v924_v22 = vsel %vm561_vm4, %v543_v34, %v923_v49  ;;  %v775_v2 = vrot.slane %v732_v20, 4  ;;  %v947_v9 = vrot.slane %v1796_v62, 4 }
 0x1e1   : > { %v932_v32 = vperm.slane %v924_v22, %v1574_v1  ;;  %v971_v36 = vrot.slane %v928_v18, 4  ;;  %v959_v53 = vrot.slane %v908_v44, 4 }
 0x1e2   : > { %1073 = vmax.xlane.f32.xlu2 %v1072_v59  ;;  %v776_v34 = vsel %vm561_vm4, %v1761_v25, %v775_v2  ;;  %v781_v25 = vrot.slane %v1731_v51, 4  ;;  %v948_v37 = vsel %vm561_vm4, %v1784_v45, %v947_v9 }
 0x1e3   : > { %v1042_v20 = vsel %vm394_vm3, %v776_v34, -inf  ;;  %v983_v51 = vrot.slane %v932_v32, 4  ;;  %v956_v0 = vperm.slane %v948_v37, %v1595_v23  ;;  %v960_v56 = vsel %vm561_vm4, %v920_v31, %v959_v53 }
 0x1e4   : > { %v782_v62 = vsel %vm561_vm4, %v781_v25, %v1713_v42 }
 0x1e5   : > { %v555_v63 = vpop.permute.xlu0 %554 }
 0x1e6   : > { %v933_v47 = vrot.slane %v555_v63, 4  ;;  %v936_v7 = vsel %vm561_vm4, %v555_v63, %v935_v54  ;;  %1040 = vmax.xlane.f32.xlu1 %v1039_v8  ;;  %v968_v8 = vperm.slane %v960_v56, %v1595_v23 }
 0x1e7   : > { %v944_v11 = vperm.slane %v936_v7, %v1574_v1 }
 0x1e8   : > { %v934_v10 = vsel %vm561_vm4, %v933_v47, %v531_v41  ;;  %1037 = vmax.xlane.f32.xlu0 %v1036_v52  ;;  %v1051_v47 = vsel %vm394_vm3, %v782_v62, -inf  ;;  %v999_v52 = vrot.slane %v956_v0, 4  ;;  %v1007_v12 = vrot.slane %v968_v8, 4 }
 0x1e9   : > { %v940_v14 = vperm.slane %v934_v10, %v1574_v1  ;;  %v981_v27 = vrot.slane %v944_v11, 4  ;;  %v958_v1 = vsel %vm561_vm4, %v957_v43, %v908_v44  ;;  %v984_v45 = vsel %vm561_vm4, %v944_v11, %v983_v51 }
 0x1ea   : > { %1034 = vmax.xlane.f32.xlu2 %v1033_v28  ;;  %v964_v63 = vperm.slane %v958_v1, %v1595_v23  ;;  %v992_v3 = vperm.slane %v984_v45, %v1595_v23 }
 0x1eb   : > { %v969_v26 = vrot.slane %v940_v14, 4  ;;  %v982_v39 = vsel %vm561_vm4, %v981_v27, %v932_v32  ;;  %v972_v41 = vsel %vm561_vm4, %v940_v14, %v971_v36 }
 0x1ec   : > { %v988_v48 = vperm.slane %v982_v39, %v1595_v23  ;;  %v980_v50 = vperm.slane %v972_v41, %v1595_v23  ;;  %v1003_v14 = vrot.slane %v964_v63, 4  ;;  %v1008_v55 = vsel %vm561_vm4, %v992_v3, %v1007_v12 }
 0x1ed   : > { %v970_v30 = vsel %vm561_vm4, %v969_v26, %v928_v18  ;;  %v1005_v16 = vrot.slane %v992_v3, 4  ;;  %v1102_v21 = vsel %vm394_vm3, %v1008_v55, -inf  ;;  %v895_v18 = vrot.slane %v1755_v19, 4 }
 0x1ee   : > { %v976_v5 = vperm.slane %v970_v30, %v1595_v23  ;;  %1049 = vmax.xlane.f32.xlu1 %v1048_v33  ;;  %v1001_v60 = vrot.slane %v988_v48, 4  ;;  %v997_v61 = vrot.slane %v980_v50, 4  ;;  %v1000_v10 = vsel %vm561_vm4, %v980_v50, %v999_v52 }
 0x1ef   : > { %v1090_v11 = vsel %vm394_vm3, %v1000_v10, -inf  ;;  %v1004_v15 = vsel %vm561_vm4, %v988_v48, %v1003_v14  ;;  %v1006_v23 = vsel %vm561_vm4, %v1005_v16, %v968_v8  ;;  %v896_v13 = vsel %vm561_vm4, %v1728_v58, %v895_v18 }
 0x1f0   : > { %1046 = vmax.xlane.f32.xlu0 %v1045_v57  ;;  %v993_v38 = vrot.slane %v976_v5, 4  ;;  %v996_v46 = vsel %vm561_vm4, %v976_v5, %v995_v40  ;;  %v1002_v4 = vsel %vm561_vm4, %v1001_v60, %v964_v63  ;;  %v998_v7 = vsel %vm561_vm4, %v997_v61, %v956_v0 }
 0x1f1   : > { %v1084_v54 = vsel %vm394_vm3, %v996_v46, -inf  ;;  %v1093_v42 = vsel %vm394_vm3, %v1002_v4, -inf  ;;  %v1087_v49 = vsel %vm394_vm3, %v998_v7, -inf  ;;  %v1096_v22 = vsel %vm394_vm3, %v1004_v15, -inf }
 0x1f2   : > { %v994_v17 = vsel %vm561_vm4, %v993_v38, %v952_v6  ;;  %1043 = vmax.xlane.f32.xlu2 %v1042_v20  ;;  %v1099_v26 = vsel %vm394_vm3, %v1006_v23, -inf  ;;  %v1078_v27 = vsel %vm394_vm3, %v896_v13, -inf  ;;  %v1137_v6 = vlaneseq }
 0x1f3   : > { %v1081_v59 = vsel %vm394_vm3, %v994_v17, -inf }
 0x1f4   : > { %v1869_v31 = vand.u32 127, %v1137_v6 }
 0x1f6   : > { %1085 = vmax.xlane.f32.xlu1 %v1084_v54 }
 0x1f8   : > { %1082 = vmax.xlane.f32.xlu0 %v1081_v59 }
 0x1fa   : > { %1052 = vmax.xlane.f32.xlu2 %v1051_v47 }
 0x1fe   : > { %1094 = vmax.xlane.f32.xlu1 %v1093_v42 }
 0x200   : > { %1088 = vmax.xlane.f32.xlu0 %v1087_v49 }
 0x202   : > { %1091 = vmax.xlane.f32.xlu2 %v1090_v11 }
 0x206   : > { %1103 = vmax.xlane.f32.xlu1 %v1102_v21 }
 0x208   : > { %1097 = vmax.xlane.f32.xlu0 %v1096_v22 }
 0x20a   : > { %1100 = vmax.xlane.f32.xlu2 %v1099_v26 }
 0x210   : > { %1079 = vmax.xlane.f32.xlu0 %v1078_v27 }
 0x229   : > { %v1032_v28 = vpop.xlane.xlu1 %1031 }
 0x22a   : > { %v1146_v9 = vperm.slane %v1032_v28, %v1869_v31 }
 0x22d   : > { %v1014_v24 = vpop.xlane.xlu2 %1013  ;;  %v1017_v30 = vpop.xlane.xlu0 %1016 }
 0x22e   : > { %v1140_v5 = vperm.slane %v1014_v24, %v1869_v31  ;;  %v1141_v36 = vperm.slane %v1017_v30, %v1869_v31 }
 0x231   : > { %v1011_v29 = vpop.xlane.xlu1 %1010 }
 0x232   : > { %v1139_v19 = vperm.slane %v1011_v29, %v1869_v31 }
 0x234   : > { %v1172_v58 = vsel %vm1171_vm5, %v1140_v5, %v1139_v19 }
 0x235   : > { %v1020_v32 = vpop.xlane.xlu2 %1019  ;;  %v1029_v2 = vpop.xlane.xlu0 %1028  ;;  %v1174_v38 = vsel %vm1173_vm6, %v1141_v36, %v1172_v58 }
 0x236   : > { %v1142_v35 = vperm.slane %v1020_v32, %v1869_v31  ;;  %v1145_v41 = vperm.slane %v1029_v2, %v1869_v31 }
 0x238   : > { %v1176_v34 = vsel %vm1175_vm7, %v1142_v35, %v1174_v38 }
 0x239   : > { %v1023_v33 = vpop.xlane.xlu1 %1022 }
 0x23a   : > { %v1143_v57 = vperm.slane %v1023_v33, %v1869_v31 }
 0x23c   : > { %v1178_v43 = vsel %vm1177_vm8, %v1143_v57, %v1176_v34 }
 0x23d   : > { %v1026_v39 = vpop.xlane.xlu2 %1025 }
 0x23e   : > { %v1144_v40 = vperm.slane %v1026_v39, %v1869_v31 }
 0x240   : > { %v1180_v46 = vsel %vm1179_vm9, %v1144_v40, %v1178_v43 }
 0x241   : > { %v1059_v44 = vpop.xlane.xlu1 %1058  ;;  %v1182_v48 = vsel %vm1181_vm10, %v1145_v41, %v1180_v46 }
 0x242   : > { %v1184_v20 = vsel %vm1183_vm11, %v1146_v9, %v1182_v48  ;;  %v1155_v54 = vperm.slane %v1059_v44, %v1869_v31 }
 0x243   : > { %1211 = vst.msk [vmem:[%s1886_s11] sm:$0xff] %vm1210_vm12, %v1184_v20 }
 0x245   : > { %v1062_v17 = vpop.xlane.xlu2 %1061 }
 0x246   : > { %v1156_v53 = vperm.slane %v1062_v17, %v1869_v31 }
 0x248   : > { %v1192_v60 = vsel %vm1171_vm5, %v1156_v53, %v1155_v54 }
 0x249   : > { %v1068_v50 = vpop.xlane.xlu1 %1067 }
 0x24a   : > { %v1158_v37 = vperm.slane %v1068_v50, %v1869_v31 }
 0x24b   : > { %v1056_v25 = vpop.xlane.xlu0 %1055 }
 0x24c   : > { %v1154_v29 = vperm.slane %v1056_v25, %v1869_v31 }
 0x24d   : > { %v1065_v1 = vpop.xlane.xlu2 %1064 }
 0x24e   : > { %v1157_v59 = vperm.slane %v1065_v1, %v1869_v31 }
 0x250   : > { %v1193_v62 = vsel %vm1173_vm6, %v1157_v59, %v1192_v60 }
 0x251   : > { %v1077_v61 = vpop.xlane.xlu1 %1076  ;;  %v1194_v51 = vsel %vm1175_vm7, %v1158_v37, %v1193_v62 }
 0x252   : > { %v1161_v7 = vperm.slane %v1077_v61, %v1869_v31 }
 0x253   : > { %v1071_v63 = vpop.xlane.xlu0 %1070 }
 0x254   : > { %v1159_v0 = vperm.slane %v1071_v63, %v1869_v31 }
 0x255   : > { %v1074_v4 = vpop.xlane.xlu2 %1073 }
 0x256   : > { %v1195_v56 = vsel %vm1177_vm8, %v1159_v0, %v1194_v51  ;;  %v1160_v47 = vperm.slane %v1074_v4, %v1869_v31 }
 0x258   : > { %v1196_v8 = vsel %vm1179_vm9, %v1160_v47, %v1195_v56 }
 0x259   : > { %v1041_v45 = vpop.xlane.xlu1 %1040  ;;  %v1197_v49 = vsel %vm1181_vm10, %v1161_v7, %v1196_v8 }
 0x25a   : > { %v1149_v15 = vperm.slane %v1041_v45, %v1869_v31 }
 0x25b   : > { %v1038_v42 = vpop.xlane.xlu0 %1037 }
 0x25c   : > { %v1148_v14 = vperm.slane %v1038_v42, %v1869_v31 }
 0x25d   : > { %v1035_v52 = vpop.xlane.xlu2 %1034 }
 0x25e   : > { %v1147_v12 = vperm.slane %v1035_v52, %v1869_v31 }
 0x260   : > { %v1185_v55 = vsel %vm1171_vm5, %v1148_v14, %v1147_v12 }
 0x261   : > { %v1050_v3 = vpop.xlane.xlu1 %1049  ;;  %v1186_v21 = vsel %vm1173_vm6, %v1149_v15, %v1185_v55 }
 0x262   : > { %v1152_v27 = vperm.slane %v1050_v3, %v1869_v31 }
 0x263   : > { %v1047_v10 = vpop.xlane.xlu0 %1046 }
 0x264   : > { %v1151_v26 = vperm.slane %v1047_v10, %v1869_v31 }
 0x265   : > { %v1044_v11 = vpop.xlane.xlu2 %1043 }
 0x266   : > { %v1150_v16 = vperm.slane %v1044_v11, %v1869_v31 }
 0x268   : > { %v1187_v18 = vsel %vm1175_vm7, %v1150_v16, %v1186_v21 }
 0x269   : > { %v1086_v22 = vpop.xlane.xlu1 %1085  ;;  %v1188_v13 = vsel %vm1177_vm8, %v1151_v26, %v1187_v18 }
 0x26a   : > { %v1189_v6 = vsel %vm1179_vm9, %v1152_v27, %v1188_v13  ;;  %v1164_v35 = vperm.slane %v1086_v22, %v1869_v31 }
 0x26b   : > { %v1083_v23 = vpop.xlane.xlu0 %1082 }
 0x26c   : > { %v1163_v19 = vperm.slane %v1083_v23, %v1869_v31 }
 0x26d   : > { %v1053_v28 = vpop.xlane.xlu2 %1052 }
 0x26e   : > { %v1153_v24 = vperm.slane %v1053_v28, %v1869_v31  ;;  %v1199_v36 = vsel %vm1171_vm5, %v1164_v35, %v1163_v19 }
 0x270   : > { %v1190_v30 = vsel %vm1181_vm10, %v1153_v24, %v1189_v6 }
 0x271   : > { %v1191_v33 = vsel %vm1183_vm11, %v1154_v29, %v1190_v30  ;;  %v1095_v5 = vpop.xlane.xlu1 %1094 }
 0x272   : > { %1212 = vst.msk [vmem:[%s1886_s11 + $0x8] sm:$0xff] %vm1210_vm12, %v1191_v33  ;;  %v1167_v41 = vperm.slane %v1095_v5, %v1869_v31 }
 0x273   : > { %v1089_v32 = vpop.xlane.xlu0 %1088 }
 0x274   : > { %v1165_v58 = vperm.slane %v1089_v32, %v1869_v31 }
 0x275   : > { %v1092_v57 = vpop.xlane.xlu2 %1091 }
 0x276   : > { %v1200_v2 = vsel %vm1173_vm6, %v1165_v58, %v1199_v36  ;;  %v1166_v38 = vperm.slane %v1092_v57, %v1869_v31 }
 0x278   : > { %v1201_v34 = vsel %vm1175_vm7, %v1166_v38, %v1200_v2 }
 0x279   : > { %v1104_v43 = vpop.xlane.xlu1 %1103  ;;  %v1202_v44 = vsel %vm1177_vm8, %v1167_v41, %v1201_v34 }
 0x27a   : > { %v1170_v20 = vperm.slane %v1104_v43, %v1869_v31 }
 0x27b   : > { %v1098_v39 = vpop.xlane.xlu0 %1097 }
 0x27c   : > { %v1168_v40 = vperm.slane %v1098_v39, %v1869_v31 }
 0x27d   : > { %v1101_v46 = vpop.xlane.xlu2 %1100 }
 0x27e   : > { %v1203_v9 = vsel %vm1179_vm9, %v1168_v40, %v1202_v44  ;;  %v1169_v48 = vperm.slane %v1101_v46, %v1869_v31 }
 0x280   : > { %v1204_v17 = vsel %vm1181_vm10, %v1169_v48, %v1203_v9 }
 0x281   : > { %v1205_v25 = vsel %vm1183_vm11, %v1170_v20, %v1204_v17 }
 0x282   : > { %1214 = vst.msk [vmem:[%s1886_s11 + $0x18] sm:$0xff] %vm1210_vm12, %v1205_v25 }
 0x283   : > { %v1080_v50 = vpop.xlane.xlu0 %1079 }
 0x284   : > { %v1162_v53 = vperm.slane %v1080_v50, %v1869_v31 }
 0x286   : > { %v1198_v54 = vsel %vm1183_vm11, %v1162_v53, %v1197_v49 }
 0x287   : > { %1213 = vst.msk [vmem:[%s1886_s11 + $0x10] sm:$0xff] %vm1210_vm12, %v1198_v54 }
 0x288 PF: > { %s17_s26 = sadd.s32 1, %s1385_s26   ;;  %s1962_s24 = smov %s1381_s25 }
 0x289   : > { %p14_p5 = scmp.ge.s32.totalorder %s17_s26, 4   ;;  %s1963_s25 = smov %s1965_s27 }
 0x28b   :  { %16 = sbr.rel (!%p14_p5) target bundleno = 2 (0x2), region = 78 }

</bundles_post_ra>
